<compile_context>
chip_gen: v7x
topology: tpu7x:2x2x1
jax: 0.10.0
libtpu: 0.0.40
codegen_flags: <defaults>
</compile_context>

<pallas_src>
import functools

import jax
import jax.numpy as jnp
from jax import lax
from jax.experimental import pallas as pl
from jax.experimental.pallas import tpu as pltpu


def _block35_kernel(
    x_ref,                                   # (B, M, 256) f32
    w1_ref, s1_ref, b1_ref,                  # fused 1x1 convs: (256,96) bf16, (1,96) f32 x2
    w3bd_ref, s3bd_ref, b3bd_ref,            # fused b1b+b2b 3x3: (576,64) bf16, (1,64) f32 x2
    w3c_ref, s3c_ref, b3c_ref,               # b2c 3x3: (288,32) bf16, (1,32) f32 x2
    wf_ref, bf_ref,                          # final 1x1 (scale folded): (96,256) bf16, (1,256) f32
    o_ref,                                   # (B, M, 256) f32
    pad64,                                   # (M + 2*PAD, 64) bf16 shift buffer (fused 3x3)
    pad32,                                   # (M + 2*PAD, 32) bf16 shift buffer (branch2c 3x3)
    *, h, w, pad, b_blk):
  M = h * w
  P = pad

  # Zero only the border pad rows, once per grid step (interiors are fully
  # overwritten before every use; borders are never written).
  pad64[pl.ds(0, P), :] = jnp.zeros((P, 64), pad64.dtype)
  pad64[pl.ds(P + M, P), :] = jnp.zeros((P, 64), pad64.dtype)
  pad32[pl.ds(0, P), :] = jnp.zeros((P, 32), pad32.dtype)
  pad32[pl.ds(P + M, P), :] = jnp.zeros((P, 32), pad32.dtype)

  # Column (dx) boundary masks, shared by every 3x3 tap gather.
  m_idx = lax.broadcasted_iota(jnp.int32, (M, 1), 0)
  ww = m_idx % w
  mask_l = ww > 0            # valid for dx == -1 taps
  mask_r = ww < (w - 1)      # valid for dx == +1 taps

  def gather_taps(buf):
    # Gather the 9 shifted taps into registers and concatenate along lanes;
    # dy out-of-image taps land in the zeroed border rows, dx taps are masked.
    taps = []
    for kh in range(3):
      for kw in range(3):
        dy, dx = kh - 1, kw - 1
        off = dy * w + dx
        tap = buf[pl.ds(P + off, M), :]
        if dx == -1:
          tap = jnp.where(mask_l, tap, jnp.zeros_like(tap))
        elif dx == 1:
          tap = jnp.where(mask_r, tap, jnp.zeros_like(tap))
        taps.append(tap)
    return jnp.concatenate(taps, axis=1)      # (M, 9*C) bf16

  for b in range(b_blk):                      # static unroll over images in this block
    x_bf = x_ref[b].astype(jnp.bfloat16)      # (M, 256)

    # ---- fused 1x1 convs (branch0 / branch1a / branch2a): one K=256 matmul ----
    y1x1 = jnp.dot(x_bf, w1_ref[...], preferred_element_type=jnp.float32)
    y1x1 = jnp.maximum(y1x1 * s1_ref[...] + b1_ref[...], 0.0)
    y0 = y1x1[:, 0:32]                        # branch0 output
    t12 = y1x1[:, 32:96]                      # [branch1a | branch2a], 64 ch side by side

    # ---- fused branch1b + branch2b 3x3 convs: block-diagonal (576,64) weight ----
    pad64[pl.ds(P, M), :] = t12.astype(pad64.dtype)
    col = gather_taps(pad64)                  # (M, 576)
    y12 = jnp.dot(col, w3bd_ref[...], preferred_element_type=jnp.float32)
    y12 = jnp.maximum(y12 * s3bd_ref[...] + b3bd_ref[...], 0.0)
    y1 = y12[:, 0:32]                         # branch1 output
    t2 = y12[:, 32:64]                        # branch2b output (input of branch2c)

    # ---- branch2c 3x3 ----
    pad32[pl.ds(P, M), :] = t2.astype(pad32.dtype)
    col2 = gather_taps(pad32)                 # (M, 288)
    y2 = jnp.dot(col2, w3c_ref[...], preferred_element_type=jnp.float32)
    y2 = jnp.maximum(y2 * s3c_ref[...] + b3c_ref[...], 0.0)

    # ---- concat + final 1x1 (residual scale folded into wf/bf) + residual + relu ----
    cat = jnp.concatenate([y0, y1, y2], axis=1).astype(jnp.bfloat16)   # (M, 96)
    out = jnp.dot(cat, wf_ref[...], preferred_element_type=jnp.float32) + bf_ref[...]
    o_ref[b] = jnp.maximum(out + x_ref[b], 0.0)


def block35_forward(x_nchw, kp, b_blk=None):
  N, C, H, W = x_nchw.shape
  assert C == 256, "Block35 expects 256 input channels"
  Mt = H * W
  # Pad must cover the largest tap offset |dy*W + dx| = W + 1; round up to a
  # sublane multiple.
  pad = ((max(W + 1, 8) + 7) // 8) * 8

  if b_blk is None:
    # Amortize per-grid-step overhead for small images, but keep >= 2 grid
    # steps when the batch allows it (v7x has 2 TensorCores).
    b_blk = max(1, min(N, 256 // Mt)) if Mt < 256 else 1
    while b_blk > 1 and N // b_blk < 2:
      b_blk -= 1
    while N % b_blk:
      b_blk -= 1
  assert N % b_blk == 0

  x3 = jnp.transpose(x_nchw, (0, 2, 3, 1)).reshape(N, Mt, C).astype(jnp.float32)

  inputs = [
      x3,
      kp['w1'], kp['s1'], kp['b1'],
      kp['w3_bd'], kp['s3_bd'], kp['b3_bd'],
      kp['w3_2c'], kp['s3_2c'], kp['b3_2c'],
      kp['wf'], kp['bf'],
  ]

  def wspec(shape):
    nd = len(shape)
    return pl.BlockSpec(shape, lambda i, _nd=nd: (0,) * _nd)

  x_spec = pl.BlockSpec((b_blk, Mt, 256), lambda i: (i, 0, 0))
  in_specs = [x_spec] + [wspec(a.shape) for a in inputs[1:]]
  out_spec = pl.BlockSpec((b_blk, Mt, 256), lambda i: (i, 0, 0))

  kernel = functools.partial(_block35_kernel, h=H, w=W, pad=pad, b_blk=b_blk)
  out3 = pl.pallas_call(
      kernel,
      out_shape=jax.ShapeDtypeStruct((N, Mt, 256), jnp.float32),
      grid=(N // b_blk,),
      in_specs=in_specs,
      out_specs=out_spec,
      scratch_shapes=[
          pltpu.VMEM((Mt + 2 * pad, 64), jnp.bfloat16),   # fused-3x3 shift buffer
          pltpu.VMEM((Mt + 2 * pad, 32), jnp.bfloat16),   # branch2c shift buffer
      ],
      compiler_params=pltpu.CompilerParams(
          dimension_semantics=("parallel",)),
  )(*inputs)
  return jnp.transpose(out3.reshape(N, H, W, 256), (0, 3, 1, 2))


# ------------------------- parameter construction -------------------------

def _fold_bn(gamma, beta, mean, var, eps=1e-3):
  s = gamma / jnp.sqrt(var + eps)
  b = beta - mean * s
  return s, b


def make_module_params(key):
  """Random parameters in PyTorch-native layouts (eval-mode BN stats)."""
  it = iter(jax.random.split(key, 64))

  def conv_w(cout, cin, k):
    return jax.random.normal(next(it), (cout, cin, k, k), jnp.float32) * 0.05

  def bn(c):
    return dict(
        gamma=jax.random.uniform(next(it), (c,), jnp.float32, minval=0.5, maxval=1.5),
        beta=jax.random.normal(next(it), (c,), jnp.float32) * 0.1,
        mean=jax.random.normal(next(it), (c,), jnp.float32) * 0.1,
        var=jax.random.uniform(next(it), (c,), jnp.float32, minval=0.5, maxval=1.5))

  return {
      'b0_w': conv_w(32, 256, 1), 'b0_bn': bn(32),
      'b1a_w': conv_w(32, 256, 1), 'b1a_bn': bn(32),
      'b1b_w': conv_w(32, 32, 3), 'b1b_bn': bn(32),
      'b2a_w': conv_w(32, 256, 1), 'b2a_bn': bn(32),
      'b2b_w': conv_w(32, 32, 3), 'b2b_bn': bn(32),
      'b2c_w': conv_w(32, 32, 3), 'b2c_bn': bn(32),
      'f_w': conv_w(256, 96, 1),
      'f_b': jax.random.normal(next(it), (256,), jnp.float32) * 0.05,
  }


def pack_kernel_params(p, scale=0.17):
  """Fold BN, fuse/reshape weights into the kernel's layouts, cast MXU operands to bf16."""
  def w1x1(w):          # (cout, cin, 1, 1) -> (cin, cout)
    return jnp.transpose(w[:, :, 0, 0], (1, 0))

  def w3x3(w):          # (cout, cin, 3, 3) -> (9*cin, cout), row order (kh, kw, cin)
    return jnp.transpose(w, (2, 3, 1, 0)).reshape(9 * w.shape[1], w.shape[0])

  def fold(bn):
    return _fold_bn(bn['gamma'], bn['beta'], bn['mean'], bn['var'])

  s0, b0 = fold(p['b0_bn'])
  s1a, b1a = fold(p['b1a_bn'])
  s2a, b2a = fold(p['b2a_bn'])
  s1b, b1b = fold(p['b1b_bn'])
  s2b, b2b = fold(p['b2b_bn'])
  s2c, b2c = fold(p['b2c_bn'])

  kp = {}
  # Fused 1x1 convs: columns [branch0 | branch1a | branch2a].
  kp['w1'] = jnp.concatenate(
      [w1x1(p['b0_w']), w1x1(p['b1a_w']), w1x1(p['b2a_w'])], axis=1).astype(jnp.bfloat16)
  kp['s1'] = jnp.concatenate([s0, s1a, s2a]).reshape(1, 96).astype(jnp.float32)
  kp['b1'] = jnp.concatenate([b0, b1a, b2a]).reshape(1, 96).astype(jnp.float32)

  # Block-diagonal fusion of branch1b and branch2b 3x3 convs.
  # im2col K layout per tap: [branch1 32ch | branch2 32ch]; output columns
  # [branch1b 32 | branch2b 32].
  w1b = w3x3(p['b1b_w']).reshape(9, 32, 32)
  w2b = w3x3(p['b2b_w']).reshape(9, 32, 32)
  z = jnp.zeros((9, 32, 32), jnp.float32)
  w_bd = jnp.concatenate(
      [jnp.concatenate([w1b, z], axis=2),
       jnp.concatenate([z, w2b], axis=2)], axis=1).reshape(576, 64)
  kp['w3_bd'] = w_bd.astype(jnp.bfloat16)
  kp['s3_bd'] = jnp.concatenate([s1b, s2b]).reshape(1, 64).astype(jnp.float32)
  kp['b3_bd'] = jnp.concatenate([b1b, b2b]).reshape(1, 64).astype(jnp.float32)

  kp['w3_2c'] = w3x3(p['b2c_w']).astype(jnp.bfloat16)
  kp['s3_2c'] = s2c.reshape(1, 32).astype(jnp.float32)
  kp['b3_2c'] = b2c.reshape(1, 32).astype(jnp.float32)

  # Final 1x1 with the residual scale folded in.
  kp['wf'] = (jnp.transpose(p['f_w'][:, :, 0, 0], (1, 0)) * scale).astype(jnp.bfloat16)
  kp['bf'] = (p['f_b'] * scale).reshape(1, 256).astype(jnp.float32)
  return kp


# --------------------------- pure-JAX reference ---------------------------

def block35_reference(x_nchw, p, scale=0.17):
  x = jnp.transpose(x_nchw, (0, 2, 3, 1)).astype(jnp.float32)   # NHWC

  def bconv(t, w, bn, padd):
    wk = jnp.transpose(w, (2, 3, 1, 0))                         # HWIO
    y = lax.conv_general_dilated(t, wk, (1, 1), [(padd, padd), (padd, padd)],
                                 dimension_numbers=('NHWC', 'HWIO', 'NHWC'))
    s, b = _fold_bn(bn['gamma'], bn['beta'], bn['mean'], bn['var'])
    return jnp.maximum(y * s + b, 0.0)

  y0 = bconv(x, p['b0_w'], p['b0_bn'], 0)
  y1 = bconv(bconv(x, p['b1a_w'], p['b1a_bn'], 0), p['b1b_w'], p['b1b_bn'], 1)
  t2 = bconv(x, p['b2a_w'], p['b2a_bn'], 0)
  t2 = bconv(t2, p['b2b_w'], p['b2b_bn'], 1)
  y2 = bconv(t2, p['b2c_w'], p['b2c_bn'], 1)
  cat = jnp.concatenate([y0, y1, y2], axis=-1)
  wf = jnp.transpose(p['f_w'][:, :, 0, 0], (1, 0))
  out = jnp.einsum('nhwc,cd->nhwd', cat, wf) + p['f_b']
  out = jnp.maximum(out * scale + x, 0.0)
  return jnp.transpose(out, (0, 3, 1, 2))


if __name__ == "__main__":
  key = jax.random.PRNGKey(0)
  kx, kp_key = jax.random.split(key)
  torch_params = make_module_params(kp_key)
  scale = 0.17
  kernel_params = pack_kernel_params(torch_params, scale)

  # Primary check: batch=2, 8x8 -> one image per grid step, grid=(2,).
  x = jax.random.normal(kx, (2, 256, 8, 8), jnp.float32)   # NCHW, as in PyTorch
  out = jax.block_until_ready(block35_forward(x, kernel_params))
  ref = block35_reference(x, torch_params, scale)
  err = float(jnp.max(jnp.abs(out - ref)))
  assert out.shape == (2, 256, 8, 8)
  assert err < 5e-2, f"max abs err {err}"

  # Secondary check exercising the multi-image-per-grid-step path (b_blk=2).
  x4 = jax.random.normal(jax.random.PRNGKey(1), (4, 256, 8, 8), jnp.float32)
  out4 = jax.block_until_ready(block35_forward(x4, kernel_params))
  ref4 = block35_reference(x4, torch_params, scale)
  err4 = float(jnp.max(jnp.abs(out4 - ref4)))
  assert err4 < 5e-2, f"max abs err {err4}"

  print("KERNEL_OK")
</pallas_src>

<mosaic_0001>
module attributes {stable_mosaic.version = 11 : i64} {
  func.func @_block35_kernel(%arg0: i32, %arg1: memref<1x64x256xf32, #tpu.memory_space<vmem>>, %arg2: memref<256x96xbf16, #tpu.memory_space<vmem>>, %arg3: memref<1x96xf32, #tpu.memory_space<vmem>>, %arg4: memref<1x96xf32, #tpu.memory_space<vmem>>, %arg5: memref<576x64xbf16, #tpu.memory_space<vmem>>, %arg6: memref<1x64xf32, #tpu.memory_space<vmem>>, %arg7: memref<1x64xf32, #tpu.memory_space<vmem>>, %arg8: memref<288x32xbf16, #tpu.memory_space<vmem>>, %arg9: memref<1x32xf32, #tpu.memory_space<vmem>>, %arg10: memref<1x32xf32, #tpu.memory_space<vmem>>, %arg11: memref<96x256xbf16, #tpu.memory_space<vmem>>, %arg12: memref<1x256xf32, #tpu.memory_space<vmem>>, %arg13: memref<1x64x256xf32, #tpu.memory_space<vmem>>, %arg14: memref<96x64xbf16, #tpu.memory_space<vmem>>, %arg15: memref<96x32xbf16, #tpu.memory_space<vmem>>) attributes {dimension_semantics = [#tpu.dimension_semantics<parallel>], iteration_bounds = array<i64: 2>, scalar_prefetch = 0 : i64, scratch_operands = 2 : i64, tpu.core_type = #tpu.core_type<tc>, window_params = [{transform_indices = @transform_0, window_bounds = array<i64: 1, 64, 256>}, {pipeline_mode = #tpu.pipeline_mode<synchronous>, transform_indices = @transform_1, window_bounds = array<i64: 256, 96>}, {pipeline_mode = #tpu.pipeline_mode<synchronous>, transform_indices = @transform_2, window_bounds = array<i64: 1, 96>}, {pipeline_mode = #tpu.pipeline_mode<synchronous>, transform_indices = @transform_3, window_bounds = array<i64: 1, 96>}, {pipeline_mode = #tpu.pipeline_mode<synchronous>, transform_indices = @transform_4, window_bounds = array<i64: 576, 64>}, {pipeline_mode = #tpu.pipeline_mode<synchronous>, transform_indices = @transform_5, window_bounds = array<i64: 1, 64>}, {pipeline_mode = #tpu.pipeline_mode<synchronous>, transform_indices = @transform_6, window_bounds = array<i64: 1, 64>}, {pipeline_mode = #tpu.pipeline_mode<synchronous>, transform_indices = @transform_7, window_bounds = array<i64: 288, 32>}, {pipeline_mode = #tpu.pipeline_mode<synchronous>, transform_indices = @transform_8, window_bounds = array<i64: 1, 32>}, {pipeline_mode = #tpu.pipeline_mode<synchronous>, transform_indices = @transform_9, window_bounds = array<i64: 1, 32>}, {pipeline_mode = #tpu.pipeline_mode<synchronous>, transform_indices = @transform_10, window_bounds = array<i64: 96, 256>}, {pipeline_mode = #tpu.pipeline_mode<synchronous>, transform_indices = @transform_11, window_bounds = array<i64: 1, 256>}, {transform_indices = @transform_12, window_bounds = array<i64: 1, 64, 256>}]} {
    %cst = arith.constant 0.000000e+00 : bf16
    %0 = vector.broadcast %cst : bf16 to vector<16x64xbf16>
    %c0 = arith.constant 0 : index
    %c0_0 = arith.constant 0 : index
    %1 = vector.load %arg14[%c0, %c0_0] : memref<96x64xbf16, #tpu.memory_space<vmem>>, vector<16x64xbf16>
    tpu.vector_store %arg14[%c0, %c0_0], %0 {strides = array<i32>} : memref<96x64xbf16, #tpu.memory_space<vmem>>, vector<16x64xbf16>,
    %cst_1 = arith.constant 0.000000e+00 : bf16
    %2 = vector.broadcast %cst_1 : bf16 to vector<16x64xbf16>
    %c80 = arith.constant 80 : index
    %c0_2 = arith.constant 0 : index
    %3 = vector.load %arg14[%c80, %c0_2] : memref<96x64xbf16, #tpu.memory_space<vmem>>, vector<16x64xbf16>
    tpu.vector_store %arg14[%c80, %c0_2], %2 {strides = array<i32>} : memref<96x64xbf16, #tpu.memory_space<vmem>>, vector<16x64xbf16>,
    %cst_3 = arith.constant 0.000000e+00 : bf16
    %4 = vector.broadcast %cst_3 : bf16 to vector<16x32xbf16>
    %c0_4 = arith.constant 0 : index
    %c0_5 = arith.constant 0 : index
    %5 = vector.load %arg15[%c0_4, %c0_5] : memref<96x32xbf16, #tpu.memory_space<vmem>>, vector<16x32xbf16>
    tpu.vector_store %arg15[%c0_4, %c0_5], %4 {strides = array<i32>} : memref<96x32xbf16, #tpu.memory_space<vmem>>, vector<16x32xbf16>,
    %cst_6 = arith.constant 0.000000e+00 : bf16
    %6 = vector.broadcast %cst_6 : bf16 to vector<16x32xbf16>
    %c80_7 = arith.constant 80 : index
    %c0_8 = arith.constant 0 : index
    %7 = vector.load %arg15[%c80_7, %c0_8] : memref<96x32xbf16, #tpu.memory_space<vmem>>, vector<16x32xbf16>
    tpu.vector_store %arg15[%c80_7, %c0_8], %6 {strides = array<i32>} : memref<96x32xbf16, #tpu.memory_space<vmem>>, vector<16x32xbf16>,
    %8 = tpu.iota {dimensions = array<i32: 0>} : vector<64x1xi32>
    %c8_i32 = arith.constant 8 : i32
    %c0_i32 = arith.constant 0 : i32
    %9 = arith.cmpi eq, %c8_i32, %c0_i32 : i32
    %c1_i32 = arith.constant 1 : i32
    %10 = arith.select %9, %c1_i32, %c8_i32 : i32
    %11 = vector.broadcast %10 : i32 to vector<64x1xi32>
    %12 = arith.remsi %8, %11 : vector<64x1xi32>
    %c0_i32_9 = arith.constant 0 : i32
    %13 = vector.broadcast %c0_i32_9 : i32 to vector<64x1xi32>
    %14 = arith.cmpi ne, %12, %13 : vector<64x1xi32>
    %c0_i32_10 = arith.constant 0 : i32
    %15 = vector.broadcast %c0_i32_10 : i32 to vector<64x1xi32>
    %16 = arith.cmpi slt, %12, %15 : vector<64x1xi32>
    %c0_i32_11 = arith.constant 0 : i32
    %17 = arith.cmpi slt, %10, %c0_i32_11 : i32
    %18 = vector.broadcast %17 : i1 to vector<64x1xi1>
    %19 = vector.broadcast %18 : vector<64x1xi1> to vector<64x1xi1>
    %20 = arith.xori %16, %19 : vector<64x1xi1>
    %21 = arith.andi %20, %14 : vector<64x1xi1>
    %22 = vector.broadcast %10 : i32 to vector<64x1xi32>
    %23 = arith.addi %12, %22 : vector<64x1xi32>
    %24 = arith.select %21, %23, %12 : vector<64x1xi1>, vector<64x1xi32>
    %c0_i32_12 = arith.constant 0 : i32
    %25 = vector.broadcast %c0_i32_12 : i32 to vector<64x1xi32>
    %26 = arith.cmpi sgt, %24, %25 : vector<64x1xi32>
    %c7_i32 = arith.constant 7 : i32
    %27 = vector.broadcast %c7_i32 : i32 to vector<64x1xi32>
    %28 = arith.cmpi slt, %24, %27 : vector<64x1xi32>
    %c0_13 = arith.constant 0 : index
    %c0_14 = arith.constant 0 : index
    %c0_15 = arith.constant 0 : index
    %29 = vector.load %arg1[%c0_13, %c0_14, %c0_15] : memref<1x64x256xf32, #tpu.memory_space<vmem>>, vector<1x64x256xf32>
    %30 = vector.shape_cast %29 : vector<1x64x256xf32> to vector<64x256xf32>
    %31 = arith.truncf %30 : vector<64x256xf32> to vector<64x256xbf16>
    %c0_16 = arith.constant 0 : index
    %c0_17 = arith.constant 0 : index
    %32 = vector.load %arg2[%c0_16, %c0_17] : memref<256x96xbf16, #tpu.memory_space<vmem>>, vector<256x96xbf16>
    %cst_18 = arith.constant dense<0.000000e+00> : vector<64x96xf32>
    %33 = tpu.matmul %31, %32, %cst_18 {dimension_numbers = #tpu.dot_dimension_numbers<[1], [0], [0], [1], [0, 0, 1, 1], [], []>} : vector<64x256xbf16>, vector<256x96xbf16>, vector<64x96xf32> -> vector<64x96xf32>
    %c0_19 = arith.constant 0 : index
    %c0_20 = arith.constant 0 : index
    %34 = vector.load %arg3[%c0_19, %c0_20] : memref<1x96xf32, #tpu.memory_space<vmem>>, vector<1x96xf32>
    %35 = vector.broadcast %34 : vector<1x96xf32> to vector<64x96xf32>
    %36 = arith.mulf %33, %35 : vector<64x96xf32>
    %c0_21 = arith.constant 0 : index
    %c0_22 = arith.constant 0 : index
    %37 = vector.load %arg4[%c0_21, %c0_22] : memref<1x96xf32, #tpu.memory_space<vmem>>, vector<1x96xf32>
    %38 = vector.broadcast %37 : vector<1x96xf32> to vector<64x96xf32>
    %39 = arith.addf %36, %38 : vector<64x96xf32>
    %cst_23 = arith.constant 0.000000e+00 : f32
    %40 = vector.broadcast %cst_23 : f32 to vector<64x96xf32>
    %41 = arith.maximumf %39, %40 : vector<64x96xf32>
    %42 = vector.extract_strided_slice %41 {offsets = [0, 0], sizes = [64, 32], strides = [1, 1]} : vector<64x96xf32> to vector<64x32xf32>
    %43 = vector.extract_strided_slice %41 {offsets = [0, 32], sizes = [64, 64], strides = [1, 1]} : vector<64x96xf32> to vector<64x64xf32>
    %44 = arith.truncf %43 : vector<64x64xf32> to vector<64x64xbf16>
    %c16 = arith.constant 16 : index
    %c0_24 = arith.constant 0 : index
    %45 = vector.load %arg14[%c16, %c0_24] : memref<96x64xbf16, #tpu.memory_space<vmem>>, vector<64x64xbf16>
    tpu.vector_store %arg14[%c16, %c0_24], %44 {strides = array<i32>} : memref<96x64xbf16, #tpu.memory_space<vmem>>, vector<64x64xbf16>,
    %c7 = arith.constant 7 : index
    %c0_25 = arith.constant 0 : index
    %46 = vector.load %arg14[%c7, %c0_25] : memref<96x64xbf16, #tpu.memory_space<vmem>>, vector<64x64xbf16>
    %cst_26 = arith.constant 0.000000e+00 : bf16
    %47 = vector.broadcast %cst_26 : bf16 to vector<64x64xbf16>
    %48 = vector.shape_cast %26 : vector<64x1xi1> to vector<64x1xi1>
    %49 = vector.broadcast %48 : vector<64x1xi1> to vector<64x64xi1>
    %50 = arith.select %49, %46, %47 : vector<64x64xi1>, vector<64x64xbf16>
    %c8 = arith.constant 8 : index
    %c0_27 = arith.constant 0 : index
    %51 = vector.load %arg14[%c8, %c0_27] : memref<96x64xbf16, #tpu.memory_space<vmem>>, vector<64x64xbf16>
    %c9 = arith.constant 9 : index
    %c0_28 = arith.constant 0 : index
    %52 = vector.load %arg14[%c9, %c0_28] : memref<96x64xbf16, #tpu.memory_space<vmem>>, vector<64x64xbf16>
    %cst_29 = arith.constant 0.000000e+00 : bf16
    %53 = vector.broadcast %cst_29 : bf16 to vector<64x64xbf16>
    %54 = vector.shape_cast %28 : vector<64x1xi1> to vector<64x1xi1>
    %55 = vector.broadcast %54 : vector<64x1xi1> to vector<64x64xi1>
    %56 = arith.select %55, %52, %53 : vector<64x64xi1>, vector<64x64xbf16>
    %c15 = arith.constant 15 : index
    %c0_30 = arith.constant 0 : index
    %57 = vector.load %arg14[%c15, %c0_30] : memref<96x64xbf16, #tpu.memory_space<vmem>>, vector<64x64xbf16>
    %cst_31 = arith.constant 0.000000e+00 : bf16
    %58 = vector.broadcast %cst_31 : bf16 to vector<64x64xbf16>
    %59 = vector.shape_cast %26 : vector<64x1xi1> to vector<64x1xi1>
    %60 = vector.broadcast %59 : vector<64x1xi1> to vector<64x64xi1>
    %61 = arith.select %60, %57, %58 : vector<64x64xi1>, vector<64x64xbf16>
    %c16_32 = arith.constant 16 : index
    %c0_33 = arith.constant 0 : index
    %62 = vector.load %arg14[%c16_32, %c0_33] : memref<96x64xbf16, #tpu.memory_space<vmem>>, vector<64x64xbf16>
    %c17 = arith.constant 17 : index
    %c0_34 = arith.constant 0 : index
    %63 = vector.load %arg14[%c17, %c0_34] : memref<96x64xbf16, #tpu.memory_space<vmem>>, vector<64x64xbf16>
    %cst_35 = arith.constant 0.000000e+00 : bf16
    %64 = vector.broadcast %cst_35 : bf16 to vector<64x64xbf16>
    %65 = vector.shape_cast %28 : vector<64x1xi1> to vector<64x1xi1>
    %66 = vector.broadcast %65 : vector<64x1xi1> to vector<64x64xi1>
    %67 = arith.select %66, %63, %64 : vector<64x64xi1>, vector<64x64xbf16>
    %c23 = arith.constant 23 : index
    %c0_36 = arith.constant 0 : index
    %68 = vector.load %arg14[%c23, %c0_36] : memref<96x64xbf16, #tpu.memory_space<vmem>>, vector<64x64xbf16>
    %cst_37 = arith.constant 0.000000e+00 : bf16
    %69 = vector.broadcast %cst_37 : bf16 to vector<64x64xbf16>
    %70 = vector.shape_cast %26 : vector<64x1xi1> to vector<64x1xi1>
    %71 = vector.broadcast %70 : vector<64x1xi1> to vector<64x64xi1>
    %72 = arith.select %71, %68, %69 : vector<64x64xi1>, vector<64x64xbf16>
    %c24 = arith.constant 24 : index
    %c0_38 = arith.constant 0 : index
    %73 = vector.load %arg14[%c24, %c0_38] : memref<96x64xbf16, #tpu.memory_space<vmem>>, vector<64x64xbf16>
    %c25 = arith.constant 25 : index
    %c0_39 = arith.constant 0 : index
    %74 = vector.load %arg14[%c25, %c0_39] : memref<96x64xbf16, #tpu.memory_space<vmem>>, vector<64x64xbf16>
    %cst_40 = arith.constant 0.000000e+00 : bf16
    %75 = vector.broadcast %cst_40 : bf16 to vector<64x64xbf16>
    %76 = vector.shape_cast %28 : vector<64x1xi1> to vector<64x1xi1>
    %77 = vector.broadcast %76 : vector<64x1xi1> to vector<64x64xi1>
    %78 = arith.select %77, %74, %75 : vector<64x64xi1>, vector<64x64xbf16>
    %79 = tpu.concatenate %50, %51, %56, %61, %62, %67, %72, %73, %78 in 1 : vector<64x64xbf16>, vector<64x64xbf16>, vector<64x64xbf16>, vector<64x64xbf16>, vector<64x64xbf16>, vector<64x64xbf16>, vector<64x64xbf16>, vector<64x64xbf16>, vector<64x64xbf16> -> vector<64x576xbf16>
    %c0_41 = arith.constant 0 : index
    %c0_42 = arith.constant 0 : index
    %80 = vector.load %arg5[%c0_41, %c0_42] : memref<576x64xbf16, #tpu.memory_space<vmem>>, vector<576x64xbf16>
    %cst_43 = arith.constant dense<0.000000e+00> : vector<64x64xf32>
    %81 = tpu.matmul %79, %80, %cst_43 {dimension_numbers = #tpu.dot_dimension_numbers<[1], [0], [0], [1], [0, 0, 1, 1], [], []>} : vector<64x576xbf16>, vector<576x64xbf16>, vector<64x64xf32> -> vector<64x64xf32>
    %c0_44 = arith.constant 0 : index
    %c0_45 = arith.constant 0 : index
    %82 = vector.load %arg6[%c0_44, %c0_45] : memref<1x64xf32, #tpu.memory_space<vmem>>, vector<1x64xf32>
    %83 = vector.broadcast %82 : vector<1x64xf32> to vector<64x64xf32>
    %84 = arith.mulf %81, %83 : vector<64x64xf32>
    %c0_46 = arith.constant 0 : index
    %c0_47 = arith.constant 0 : index
    %85 = vector.load %arg7[%c0_46, %c0_47] : memref<1x64xf32, #tpu.memory_space<vmem>>, vector<1x64xf32>
    %86 = vector.broadcast %85 : vector<1x64xf32> to vector<64x64xf32>
    %87 = arith.addf %84, %86 : vector<64x64xf32>
    %cst_48 = arith.constant 0.000000e+00 : f32
    %88 = vector.broadcast %cst_48 : f32 to vector<64x64xf32>
    %89 = arith.maximumf %87, %88 : vector<64x64xf32>
    %90 = vector.extract_strided_slice %89 {offsets = [0, 0], sizes = [64, 32], strides = [1, 1]} : vector<64x64xf32> to vector<64x32xf32>
    %91 = vector.extract_strided_slice %89 {offsets = [0, 32], sizes = [64, 32], strides = [1, 1]} : vector<64x64xf32> to vector<64x32xf32>
    %92 = arith.truncf %91 : vector<64x32xf32> to vector<64x32xbf16>
    %c16_49 = arith.constant 16 : index
    %c0_50 = arith.constant 0 : index
    %93 = vector.load %arg15[%c16_49, %c0_50] : memref<96x32xbf16, #tpu.memory_space<vmem>>, vector<64x32xbf16>
    tpu.vector_store %arg15[%c16_49, %c0_50], %92 {strides = array<i32>} : memref<96x32xbf16, #tpu.memory_space<vmem>>, vector<64x32xbf16>,
    %c7_51 = arith.constant 7 : index
    %c0_52 = arith.constant 0 : index
    %94 = vector.load %arg15[%c7_51, %c0_52] : memref<96x32xbf16, #tpu.memory_space<vmem>>, vector<64x32xbf16>
    %cst_53 = arith.constant 0.000000e+00 : bf16
    %95 = vector.broadcast %cst_53 : bf16 to vector<64x32xbf16>
    %96 = vector.shape_cast %26 : vector<64x1xi1> to vector<64x1xi1>
    %97 = vector.broadcast %96 : vector<64x1xi1> to vector<64x32xi1>
    %98 = arith.select %97, %94, %95 : vector<64x32xi1>, vector<64x32xbf16>
    %c8_54 = arith.constant 8 : index
    %c0_55 = arith.constant 0 : index
    %99 = vector.load %arg15[%c8_54, %c0_55] : memref<96x32xbf16, #tpu.memory_space<vmem>>, vector<64x32xbf16>
    %c9_56 = arith.constant 9 : index
    %c0_57 = arith.constant 0 : index
    %100 = vector.load %arg15[%c9_56, %c0_57] : memref<96x32xbf16, #tpu.memory_space<vmem>>, vector<64x32xbf16>
    %cst_58 = arith.constant 0.000000e+00 : bf16
    %101 = vector.broadcast %cst_58 : bf16 to vector<64x32xbf16>
    %102 = vector.shape_cast %28 : vector<64x1xi1> to vector<64x1xi1>
    %103 = vector.broadcast %102 : vector<64x1xi1> to vector<64x32xi1>
    %104 = arith.select %103, %100, %101 : vector<64x32xi1>, vector<64x32xbf16>
    %c15_59 = arith.constant 15 : index
    %c0_60 = arith.constant 0 : index
    %105 = vector.load %arg15[%c15_59, %c0_60] : memref<96x32xbf16, #tpu.memory_space<vmem>>, vector<64x32xbf16>
    %cst_61 = arith.constant 0.000000e+00 : bf16
    %106 = vector.broadcast %cst_61 : bf16 to vector<64x32xbf16>
    %107 = vector.shape_cast %26 : vector<64x1xi1> to vector<64x1xi1>
    %108 = vector.broadcast %107 : vector<64x1xi1> to vector<64x32xi1>
    %109 = arith.select %108, %105, %106 : vector<64x32xi1>, vector<64x32xbf16>
    %c16_62 = arith.constant 16 : index
    %c0_63 = arith.constant 0 : index
    %110 = vector.load %arg15[%c16_62, %c0_63] : memref<96x32xbf16, #tpu.memory_space<vmem>>, vector<64x32xbf16>
    %c17_64 = arith.constant 17 : index
    %c0_65 = arith.constant 0 : index
    %111 = vector.load %arg15[%c17_64, %c0_65] : memref<96x32xbf16, #tpu.memory_space<vmem>>, vector<64x32xbf16>
    %cst_66 = arith.constant 0.000000e+00 : bf16
    %112 = vector.broadcast %cst_66 : bf16 to vector<64x32xbf16>
    %113 = vector.shape_cast %28 : vector<64x1xi1> to vector<64x1xi1>
    %114 = vector.broadcast %113 : vector<64x1xi1> to vector<64x32xi1>
    %115 = arith.select %114, %111, %112 : vector<64x32xi1>, vector<64x32xbf16>
    %c23_67 = arith.constant 23 : index
    %c0_68 = arith.constant 0 : index
    %116 = vector.load %arg15[%c23_67, %c0_68] : memref<96x32xbf16, #tpu.memory_space<vmem>>, vector<64x32xbf16>
    %cst_69 = arith.constant 0.000000e+00 : bf16
    %117 = vector.broadcast %cst_69 : bf16 to vector<64x32xbf16>
    %118 = vector.shape_cast %26 : vector<64x1xi1> to vector<64x1xi1>
    %119 = vector.broadcast %118 : vector<64x1xi1> to vector<64x32xi1>
    %120 = arith.select %119, %116, %117 : vector<64x32xi1>, vector<64x32xbf16>
    %c24_70 = arith.constant 24 : index
    %c0_71 = arith.constant 0 : index
    %121 = vector.load %arg15[%c24_70, %c0_71] : memref<96x32xbf16, #tpu.memory_space<vmem>>, vector<64x32xbf16>
    %c25_72 = arith.constant 25 : index
    %c0_73 = arith.constant 0 : index
    %122 = vector.load %arg15[%c25_72, %c0_73] : memref<96x32xbf16, #tpu.memory_space<vmem>>, vector<64x32xbf16>
    %cst_74 = arith.constant 0.000000e+00 : bf16
    %123 = vector.broadcast %cst_74 : bf16 to vector<64x32xbf16>
    %124 = vector.shape_cast %28 : vector<64x1xi1> to vector<64x1xi1>
    %125 = vector.broadcast %124 : vector<64x1xi1> to vector<64x32xi1>
    %126 = arith.select %125, %122, %123 : vector<64x32xi1>, vector<64x32xbf16>
    %127 = tpu.concatenate %98, %99, %104, %109, %110, %115, %120, %121, %126 in 1 : vector<64x32xbf16>, vector<64x32xbf16>, vector<64x32xbf16>, vector<64x32xbf16>, vector<64x32xbf16>, vector<64x32xbf16>, vector<64x32xbf16>, vector<64x32xbf16>, vector<64x32xbf16> -> vector<64x288xbf16>
    %c0_75 = arith.constant 0 : index
    %c0_76 = arith.constant 0 : index
    %128 = vector.load %arg8[%c0_75, %c0_76] : memref<288x32xbf16, #tpu.memory_space<vmem>>, vector<288x32xbf16>
    %cst_77 = arith.constant dense<0.000000e+00> : vector<64x32xf32>
    %129 = tpu.matmul %127, %128, %cst_77 {dimension_numbers = #tpu.dot_dimension_numbers<[1], [0], [0], [1], [0, 0, 1, 1], [], []>} : vector<64x288xbf16>, vector<288x32xbf16>, vector<64x32xf32> -> vector<64x32xf32>
    %c0_78 = arith.constant 0 : index
    %c0_79 = arith.constant 0 : index
    %130 = vector.load %arg9[%c0_78, %c0_79] : memref<1x32xf32, #tpu.memory_space<vmem>>, vector<1x32xf32>
    %131 = vector.broadcast %130 : vector<1x32xf32> to vector<64x32xf32>
    %132 = arith.mulf %129, %131 : vector<64x32xf32>
    %c0_80 = arith.constant 0 : index
    %c0_81 = arith.constant 0 : index
    %133 = vector.load %arg10[%c0_80, %c0_81] : memref<1x32xf32, #tpu.memory_space<vmem>>, vector<1x32xf32>
    %134 = vector.broadcast %133 : vector<1x32xf32> to vector<64x32xf32>
    %135 = arith.addf %132, %134 : vector<64x32xf32>
    %cst_82 = arith.constant 0.000000e+00 : f32
    %136 = vector.broadcast %cst_82 : f32 to vector<64x32xf32>
    %137 = arith.maximumf %135, %136 : vector<64x32xf32>
    %138 = tpu.concatenate %42, %90, %137 in 1 : vector<64x32xf32>, vector<64x32xf32>, vector<64x32xf32> -> vector<64x96xf32>
    %139 = arith.truncf %138 : vector<64x96xf32> to vector<64x96xbf16>
    %c0_83 = arith.constant 0 : index
    %c0_84 = arith.constant 0 : index
    %140 = vector.load %arg11[%c0_83, %c0_84] : memref<96x256xbf16, #tpu.memory_space<vmem>>, vector<96x256xbf16>
    %cst_85 = arith.constant dense<0.000000e+00> : vector<64x256xf32>
    %141 = tpu.matmul %139, %140, %cst_85 {dimension_numbers = #tpu.dot_dimension_numbers<[1], [0], [0], [1], [0, 0, 1, 1], [], []>} : vector<64x96xbf16>, vector<96x256xbf16>, vector<64x256xf32> -> vector<64x256xf32>
    %c0_86 = arith.constant 0 : index
    %c0_87 = arith.constant 0 : index
    %142 = vector.load %arg12[%c0_86, %c0_87] : memref<1x256xf32, #tpu.memory_space<vmem>>, vector<1x256xf32>
    %143 = vector.broadcast %142 : vector<1x256xf32> to vector<64x256xf32>
    %144 = arith.addf %141, %143 : vector<64x256xf32>
    %c0_88 = arith.constant 0 : index
    %c0_89 = arith.constant 0 : index
    %c0_90 = arith.constant 0 : index
    %145 = vector.load %arg1[%c0_88, %c0_89, %c0_90] : memref<1x64x256xf32, #tpu.memory_space<vmem>>, vector<1x64x256xf32>
    %146 = vector.shape_cast %145 : vector<1x64x256xf32> to vector<64x256xf32>
    %147 = arith.addf %144, %146 : vector<64x256xf32>
    %cst_91 = arith.constant 0.000000e+00 : f32
    %148 = vector.broadcast %cst_91 : f32 to vector<64x256xf32>
    %149 = arith.maximumf %147, %148 : vector<64x256xf32>
    %c0_92 = arith.constant 0 : index
    %c0_93 = arith.constant 0 : index
    %c0_94 = arith.constant 0 : index
    %150 = vector.load %arg13[%c0_92, %c0_93, %c0_94] : memref<1x64x256xf32, #tpu.memory_space<vmem>>, vector<1x64x256xf32>
    %151 = vector.shape_cast %150 : vector<1x64x256xf32> to vector<64x256xf32>
    %152 = vector.shape_cast %149 : vector<64x256xf32> to vector<1x64x256xf32>
    tpu.vector_store %arg13[%c0_92, %c0_93, %c0_94], %152 {strides = array<i32>} : memref<1x64x256xf32, #tpu.memory_space<vmem>>, vector<1x64x256xf32>,
    return
  }
  func.func @transform_0(%arg0: i32) -> (i32, i32, i32) {
    %c0_i32 = arith.constant 0 : i32
    %c0_i32_0 = arith.constant 0 : i32
    %c0_i32_1 = arith.constant 0 : i32
    return %arg0, %c0_i32, %c0_i32_0 : i32, i32, i32
  }
  func.func @transform_1(%arg0: i32) -> (i32, i32) {
    %c0_i32 = arith.constant 0 : i32
    %c0_i32_0 = arith.constant 0 : i32
    %c0_i32_1 = arith.constant 0 : i32
    return %c0_i32, %c0_i32_0 : i32, i32
  }
  func.func @transform_2(%arg0: i32) -> (i32, i32) {
    %c0_i32 = arith.constant 0 : i32
    %c0_i32_0 = arith.constant 0 : i32
    %c0_i32_1 = arith.constant 0 : i32
    return %c0_i32, %c0_i32_0 : i32, i32
  }
  func.func @transform_3(%arg0: i32) -> (i32, i32) {
    %c0_i32 = arith.constant 0 : i32
    %c0_i32_0 = arith.constant 0 : i32
    %c0_i32_1 = arith.constant 0 : i32
    return %c0_i32, %c0_i32_0 : i32, i32
  }
  func.func @transform_4(%arg0: i32) -> (i32, i32) {
    %c0_i32 = arith.constant 0 : i32
    %c0_i32_0 = arith.constant 0 : i32
    %c0_i32_1 = arith.constant 0 : i32
    return %c0_i32, %c0_i32_0 : i32, i32
  }
  func.func @transform_5(%arg0: i32) -> (i32, i32) {
    %c0_i32 = arith.constant 0 : i32
    %c0_i32_0 = arith.constant 0 : i32
    %c0_i32_1 = arith.constant 0 : i32
    return %c0_i32, %c0_i32_0 : i32, i32
  }
  func.func @transform_6(%arg0: i32) -> (i32, i32) {
    %c0_i32 = arith.constant 0 : i32
    %c0_i32_0 = arith.constant 0 : i32
    %c0_i32_1 = arith.constant 0 : i32
    return %c0_i32, %c0_i32_0 : i32, i32
  }
  func.func @transform_7(%arg0: i32) -> (i32, i32) {
    %c0_i32 = arith.constant 0 : i32
    %c0_i32_0 = arith.constant 0 : i32
    %c0_i32_1 = arith.constant 0 : i32
    return %c0_i32, %c0_i32_0 : i32, i32
  }
  func.func @transform_8(%arg0: i32) -> (i32, i32) {
    %c0_i32 = arith.constant 0 : i32
    %c0_i32_0 = arith.constant 0 : i32
    %c0_i32_1 = arith.constant 0 : i32
    return %c0_i32, %c0_i32_0 : i32, i32
  }
  func.func @transform_9(%arg0: i32) -> (i32, i32) {
    %c0_i32 = arith.constant 0 : i32
    %c0_i32_0 = arith.constant 0 : i32
    %c0_i32_1 = arith.constant 0 : i32
    return %c0_i32, %c0_i32_0 : i32, i32
  }
  func.func @transform_10(%arg0: i32) -> (i32, i32) {
    %c0_i32 = arith.constant 0 : i32
    %c0_i32_0 = arith.constant 0 : i32
    %c0_i32_1 = arith.constant 0 : i32
    return %c0_i32, %c0_i32_0 : i32, i32
  }
  func.func @transform_11(%arg0: i32) -> (i32, i32) {
    %c0_i32 = arith.constant 0 : i32
    %c0_i32_0 = arith.constant 0 : i32
    %c0_i32_1 = arith.constant 0 : i32
    return %c0_i32, %c0_i32_0 : i32, i32
  }
  func.func @transform_12(%arg0: i32) -> (i32, i32, i32) {
    %c0_i32 = arith.constant 0 : i32
    %c0_i32_0 = arith.constant 0 : i32
    %c0_i32_1 = arith.constant 0 : i32
    return %arg0, %c0_i32, %c0_i32_0 : i32, i32, i32
  }
}

</mosaic_0001>

<bundles_post_ra>
// kernel: tpu_custom_call.1
= control target key start
LH: loop header
LB: loop body
LE: loop exit
PB: predicated region body
PF: predicated region fallthrough
CT: control target
= control target key end

     0   :  { %17 = vsyncpa [#allocation5], 0  ;;  %s5395_s0 = inlined_call_operand.vmem [shape: f32[2,64,256], index: 0, kind: input, shape index: {}]   ;;  %s5396_s1 = inlined_call_operand.vmem [shape: bf16[256,96], index: 1, kind: input, shape index: {}]   ;;  %s5397_s2 = inlined_call_operand.vmem [shape: f32[1,96], index: 2, kind: input, shape index: {}]   ;;  %s5398_s3 = inlined_call_operand.vmem [shape: f32[1,96], index: 3, kind: input, shape index: {}]   ;;  %s5399_s4 = inlined_call_operand.vmem [shape: bf16[576,64], index: 4, kind: input, shape index: {}]   ;;  %s5400_s5 = inlined_call_operand.vmem [shape: f32[1,64], index: 5, kind: input, shape index: {}]   ;;  %s5401_s6 = inlined_call_operand.vmem [shape: f32[1,64], index: 6, kind: input, shape index: {}]   ;;  %s5402_s7 = inlined_call_operand.vmem [shape: bf16[288,32], index: 7, kind: input, shape index: {}]   ;;  %s5403_s8 = inlined_call_operand.vmem [shape: f32[1,32], index: 8, kind: input, shape index: {}]   ;;  %s5404_s9 = inlined_call_operand.vmem [shape: f32[1,32], index: 9, kind: input, shape index: {}]   ;;  %s5405_s10 = inlined_call_operand.vmem [shape: bf16[96,256], index: 10, kind: input, shape index: {}]   ;;  %s5406_s11 = inlined_call_operand.vmem [shape: f32[1,256], index: 11, kind: input, shape index: {}]   ;;  %s5407_s12 = inlined_call_operand.hbm [shape: f32[2,64,256], index: 12, kind: output, shape index: {}]  }
   0x1   :  { %19 = vsyncpa [#allocation5 + $0x1], 0  ;;  %s3870_s21 = smov 0   ;;  %s3872_s22 = smov 0  }
   0x2   :  { %s3874_s23 = smov 0   ;;  %s3876_s24 = smov 0  }
   0x3 LB: > { %5444 = sst [smem:[#allocation7_spill]] %s3792_s23  ;;  %s3891_s25 = sadd.s32 4294967295, %s3796_s24   ;;  %s3796_s24 = sphi %s3876_s24, %s5521_s24   ;;  %s3792_s23 = sphi %s3874_s23, %s5523_s23   ;;  %s3788_s22 = sphi %s3872_s22, %s5525_s22   ;;  %s3784_s21 = sphi %s3870_s21, %s5524_s21  }
   0x4   : > { %s3237_s26 = sadd.s32 4294967294, %s3796_s24   ;;  %s3895_s27 = sadd.s32 1, %s3796_s24  }
   0x5   : > { %5445 = sst [smem:[#allocation8_spill]] %s3895_s27  ;;  %s289_s28 = sadd.s32 1, %s3792_s23 }
   0x6   : > { %s286_s29 = ssub.s32 %s3796_s24, %s3895_s27  ;;  %p299_p0 = scmp.ne.s32.totalorder %s3792_s23, %s3788_s22 }
   0x7   : > { %p287_p1 = scmp.eq.s32.totalorder %s286_s29, 0  ;;  %p300_p2 = scmp.eq.s32.totalorder %s3891_s25, 1 }
   0x8   : > { %p305_p3 = scmp.ne.s32.totalorder %s3788_s22, %s3784_s21  ;;  %p306_p4 = scmp.eq.s32.totalorder %s3237_s26, 1 }
   0x9   : > { %s3906_s30 = scalar_select %p287_p1, %s3792_s23, %s289_s28  }
   0xa   : > { %p3908_p5 = por %p300_p2, %p299_p0  ;;  %p3912_p6 = por %p306_p4, %p305_p3 }
   0xb   : > { %5446 = sst [smem:[#allocation9_spill]] %s3906_s30  ;;  %p3240_p7 = scmp.ge.s32.totalorder %s3796_s24, 1 }
   0xc   : > { %p365_p8 = scmp.lt.s32.totalorder %s3796_s24, 3 }
   0xe   : > { %p366_p9 = pnand %p3240_p7, %p365_p8 }
  0x10   : > { %369 = sbr.rel (%p366_p9) target bundleno = 1689 (0x699), region = 68 }
  0x17   : > { %v3646_v0 = vld [vmem:[%s5396_s1 + $0x40] sm:$0xff]   ;;  %v3648_v2 = vld [vmem:[%s5396_s1 + $0x48] sm:$0xff]   ;;  %p407_p10 = scmp.lt.s32.totalorder %s3891_s25, 1  ;;  %v3650_v4 = vld [vmem:[%s5396_s1 + $0x50] sm:$0xff]   ;;  %v421_v40 = vlaneseq  ;;  %vm415_vm0 = vcmask 523264   ;;  %v5422_v45 = vmov 0  }
  0x18   : > { %v3647_v1 = vld [vmem:[%s5396_s1] sm:$0xff]   ;;  %3359 = vmatprep.subr.bf16.mxu0 %v3646_v0  ;;  %v3649_v3 = vld [vmem:[%s5396_s1 + $0x8] sm:$0xff]   ;;  %v3651_v5 = vld [vmem:[%s5396_s1 + $0x10] sm:$0xff]   ;;  %416 = vst.msk [vmem:[#allocation2] sm:$0xff] %vm415_vm0, %v5422_v45  ;;  %s3799_s26 = smov 96   ;;  %s3800_s15 = smov 64  }
  0x19   : > { %3360 = vmatpush3.bf16.msra.mxu0 %v3647_v1  ;;  %s408_s16 = scalar_select %p407_p10, %s3891_s25, 1  ;;  %v3652_v6 = vld [vmem:[%s5396_s1 + $0x58] sm:$0xff]   ;;  %v3654_v8 = vld [vmem:[%s5396_s1 + $0x60] sm:$0xff]   ;;  %v3656_v10 = vld [vmem:[%s5396_s1 + $0x68] sm:$0xff]   ;;  %v3989_v41 = vshrl.u32 %v421_v40, 7  ;;  %417 = vst.msk [vmem:[#allocation2 + $0x28] sm:$0xff] %vm415_vm0, %v5422_v45 }
  0x1a   : > { %3361 = vmatprep.subr.bf16.mxu0 %v3648_v2  ;;  %v3653_v7 = vld [vmem:[%s5396_s1 + $0x18] sm:$0xff]   ;;  %v3655_v9 = vld [vmem:[%s5396_s1 + $0x20] sm:$0xff]   ;;  %v3657_v14 = vld [vmem:[%s5396_s1 + $0x28] sm:$0xff]   ;;  %s3358_s19 = sshll.u32 %s3891_s25, 11  ;;  %s3802_s29 = smov [#allocation4]  }
  0x1b   : > { %s3357_s30 = sshll.u32 %s408_s16, 7  ;;  %v3658_v15 = vld [vmem:[%s5396_s1 + $0x70] sm:$0xff]   ;;  %v3660_v17 = vld [vmem:[%s5396_s1 + $0x78] sm:$0xff]   ;;  %5449 = vst [vmem:[#allocation10_spill] sm:$0xff] %v3989_v41  ;;  %v423_v42 = vadd.s32 8, %v3989_v41  ;;  %v434_v43 = vand.u32 7, %v3989_v41  ;;  %s5345_s28 = scalar_lea.hbm %s5407_s12, %s3358_s19 }
  0x1c   : > { %s3950_s17 = scalar_lea.vmem %s5395_s0, %s3357_s30  ;;  %v3659_v16 = vld [vmem:[%s5396_s1 + $0x30] sm:$0xff]   ;;  %v3661_v18 = vld [vmem:[%s5396_s1 + $0x38] sm:$0xff]   ;;  %v4000_v48 = vld [vmem:[%s5397_s2] ss:$0 sm:$0xff]  ;;  %v424_v53 = vadd.s32 16, %v3989_v41  ;;  %v425_v58 = vadd.s32 24, %v3989_v41 }
  0x1d   : > { %3362 = vmatpush3.bf16.msra.mxu0 %v3649_v3  ;;  %v543_v11 = vld [vmem:[%s3950_s17 + $0x8] sm:$0xff]  ;;  %v545_v12 = vld [vmem:[%s3950_s17 + $0x18] sm:$0xff]  ;;  %v542_v19 = vld [vmem:[%s3950_s17] sm:$0xff]  ;;  %v441_v44 = vand.u32 7, %v423_v42  ;;  %vm534_vm1 = vcmp.lt.s32.totalorder %v434_v43, 7  ;;  %v4022_v3 = vadd.s32 32, %v3989_v41 }
  0x1e   : > { %3363 = vmatprep.subr.bf16.mxu0 %v3650_v4  ;;  %v559_v13 = vpack.c.bf16 %v545_v12, %v543_v11  ;;  %v544_v20 = vld [vmem:[%s3950_s17 + $0x10] sm:$0xff]  ;;  %v547_v21 = vld [vmem:[%s3950_s17 + $0x28] sm:$0xff]  ;;  %v549_v22 = vld [vmem:[%s3950_s17 + $0x38] sm:$0xff]  ;;  %v448_v61 = vand.u32 7, %v424_v53  ;;  %v455_v2 = vand.u32 7, %v425_v58  ;;  %vm4026_vm5 = vcmp.gt.s32.totalorder %v434_v43, 0 }
  0x1f   : > { %v558_v23 = vpack.c.bf16 %v544_v20, %v542_v19  ;;  %v561_v24 = vpack.c.bf16 %v549_v22, %v547_v21  ;;  %v546_v25 = vld [vmem:[%s3950_s17 + $0x20] sm:$0xff]  ;;  %v548_v26 = vld [vmem:[%s3950_s17 + $0x30] sm:$0xff]  ;;  %v551_v27 = vld [vmem:[%s3950_s17 + $0x48] sm:$0xff]  ;;  %vm535_vm2 = vcmp.lt.s32.totalorder %v441_v44, 7  ;;  %v4034_v11 = vadd.s32 56, %v3989_v41  ;;  %s3801_s30 = smov 32  }
  0x20   : > { %726 = vmatprep.mubr.bf16.mxu0 %v559_v13  ;;  %v553_v28 = vld [vmem:[%s3950_s17 + $0x58] sm:$0xff]  ;;  %v560_v29 = vpack.c.bf16 %v548_v26, %v546_v25  ;;  %v550_v31 = vld [vmem:[%s3950_s17 + $0x40] sm:$0xff]  ;;  %v552_v32 = vld [vmem:[%s3950_s17 + $0x50] sm:$0xff]  ;;  %vm4037_vm6 = vcmp.lt.s32.totalorder %v448_v61, 7  ;;  %vm4046_vm7 = vcmp.gt.s32.totalorder %v441_v44, 0  ;;  %v462_v19 = vand.u32 7, %v4022_v3 }
  0x21   : > { %3364 = vmatpush3.bf16.msra.mxu0 %v3651_v5  ;;  %v563_v30 = vpack.c.bf16 %v553_v28, %v551_v27  ;;  %v555_v33 = vld [vmem:[%s3950_s17 + $0x68] sm:$0xff]  ;;  %v557_v34 = vld [vmem:[%s3950_s17 + $0x78] sm:$0xff]  ;;  %v562_v35 = vpack.c.bf16 %v552_v32, %v550_v31  ;;  %v554_v37 = vld [vmem:[%s3950_s17 + $0x60] sm:$0xff]  ;;  %vm4055_vm9 = vcmp.lt.s32.totalorder %v455_v2, 7  ;;  %vm4068_vm11 = vcmp.gt.s32.totalorder %v448_v61, 0  ;;  %s404_s16 = sand.u32 1, %s3788_s22  }
  0x22   : > { %3365 = vmatprep.subr.bf16.mxu0 %v3652_v6  ;;  %v565_v36 = vpack.c.bf16 %v557_v34, %v555_v33  ;;  %v556_v38 = vld [vmem:[%s3950_s17 + $0x70] sm:$0xff]  ;;  %vm934_vm3 = vmpackc.low %vm534_vm1, %vm534_vm1  ;;  %v4005_v52 = vld [vmem:[%s5398_s3] ss:$0 sm:$0xff]  ;;  %v483_v25 = vand.u32 7, %v4034_v11  ;;  %vm4082_vm13 = vcmp.gt.s32.totalorder %v455_v2, 0  ;;  %vm4095_vm15 = vcmp.gt.s32.totalorder %v462_v19, 0 }
  0x23   : > { %v564_v39 = vpack.c.bf16 %v556_v38, %v554_v37  ;;  %vm935_vm4 = vmpackc.low %vm535_vm2, %vm535_vm2  ;;  %v942_v56 = vsel %vm934_vm3, 65537, %v5422_v45  ;;  %s5354_s25 = scalar_lea.sflag [#allocation5], %s404_s16 }
  0x24   : > { %v943_v57 = vsel %vm935_vm4, 65537, %v5422_v45  ;;  %vm842_vm8 = vmpackc.low %vm4026_vm5, %vm4026_vm5  ;;  %vm4120_vm4 = vcmp.gt.s32.totalorder %v483_v25, 0 }
  0x25   : > { %3366 = vmatpush3.bf16.msra.mxu0 %v3653_v7  ;;  %v4016_v62 = vcombine.low %v942_v56, %v943_v57  ;;  %vm936_vm10 = vmpackc.low %vm4037_vm6, %vm4037_vm6  ;;  %v850_v31 = vsel %vm842_vm8, 65537, %v5422_v45 }
  0x26   : > { %3367 = vmatprep.subr.bf16.mxu0 %v3654_v8  ;;  %vm843_vm12 = vmpackc.low %vm4046_vm7, %vm4046_vm7 }
  0x27   : > { %v964_v12 = vshrl.u32 %v4016_v62, 16  ;;  %v967_v27 = vshll.u32 %v4016_v62, 16  ;;  %vm937_vm14 = vmpackc.low %vm4055_vm9, %vm4055_vm9  ;;  %v851_v44 = vsel %vm843_vm12, 65537, %v5422_v45  ;;  %vm538_vm9 = vcmp.lt.s32.totalorder %v462_v19, 7 }
  0x28   : > { %vm844_vm1 = vmpackc.low %vm4068_vm11, %vm4068_vm11 }
  0x29   : > { %3368 = vmatpush3.bf16.msra.mxu0 %v3655_v9  ;;  %v966_v26 = vrot.slane %v964_v12, 3  ;;  %vm845_vm3 = vmpackc.low %vm4082_vm13, %vm4082_vm13  ;;  %v852_v61 = vsel %vm844_vm1, 65537, %v5422_v45 }
  0x2a   : > { %3369 = vmatprep.subr.bf16.mxu0 %v3656_v10  ;;  %v4031_v10 = vadd.s32 48, %v3989_v41  ;;  %vm846_vm5 = vmpackc.low %vm4095_vm15, %vm4095_vm15  ;;  %v853_v3 = vsel %vm845_vm3, 65537, %v5422_v45  ;;  %vm541_vm15 = vcmp.lt.s32.totalorder %v483_v25, 7 }
  0x2b   : > { %vm849_vm8 = vmpackc.low %vm4120_vm4, %vm4120_vm4  ;;  %v4233_v42 = vcombine.low %v852_v61, %v853_v3  ;;  %vm5437_vm4 = vsmask.f32 3328 }
  0x2c   : > { %vm941_vm3 = vmpackc.low %vm541_vm15, %vm541_vm15  ;;  %vm1033_vm15 = vsmask.f32 256 }
  0x2d   : > { %3370 = vmatpush3.bf16.msra.mxu0 %v3657_v14  ;;  %v883_v61 = vshll.u32 %v4233_v42, 16 }
  0x2e   : > { %3371 = vmatprep.subr.bf16.mxu0 %v3658_v15 }
  0x31   : > { %3372 = vmatpush3.bf16.msra.mxu0 %v3659_v16 }
  0x32   : > { %3373 = vmatprep.subr.bf16.mxu0 %v3660_v17 }
  0x35   : > { %3374 = vmatpush3.bf16.msra.mxu0 %v3661_v18  ;;  %v427_v18 = vadd.s32 40, %v3989_v41 }
  0x37   : > { %v469_v33 = vand.u32 7, %v427_v18  ;;  %v857_v18 = vsel %vm849_vm8, 65537, %v5422_v45 }
  0x38   : > { %727 = vmatmul.mubr.bf16.vlgmr.msra.gmra.mrb[0].mxu0 %v558_v23  ;;  %v476_v23 = vand.u32 7, %v4031_v10 }
  0x39   : > { %734 = vmatprep.mubr.bf16.mxu0 %v561_v24  ;;  %vm4142_vm6 = vcmp.gt.s32.totalorder %v469_v33, 0  ;;  %vm539_vm12 = vcmp.lt.s32.totalorder %v469_v33, 7 }
  0x3a   : > { %vm4107_vm2 = vcmp.gt.s32.totalorder %v476_v23, 0  ;;  %vm847_vm11 = vmpackc.low %vm4142_vm6, %vm4142_vm6 }
  0x3b   : > { %vm848_vm7 = vmpackc.low %vm4107_vm2, %vm4107_vm2  ;;  %vm962_vm2 = vsmask.f32 4352  ;;  %v855_v25 = vsel %vm847_vm11, 65537, %v5422_v45  ;;  %vm1123_vm11 = vcmask 1046528  }
  0x3c   : > { %vm939_vm13 = vmpackc.low %vm539_vm12, %vm539_vm12 }
  0x3d   : > { %v947_v19 = vsel %vm939_vm13, 65537, %v5422_v45 }
  0x40   : > { %735 = vmatmul.mubr.bf16.gmra.mrb[4].mxu0 %v560_v29 }
  0x41   : > { %742 = vmatprep.mubr.bf16.mxu0 %v563_v30 }
  0x48   : > { %743 = vmatmul.mubr.bf16.gmra.mrb[8].mxu0 %v562_v35  ;;  %v969_v35 = vrot.slane %v967_v27, 4 }
  0x49   : > { %750 = vmatprep.mubr.bf16.mxu0 %v565_v36  ;;  %v944_v36 = vsel %vm936_vm10, 65537, %v5422_v45  ;;  %vm938_vm10 = vmpackc.low %vm538_vm9, %vm538_vm9 }
  0x4a   : > { %v946_v11 = vsel %vm938_vm10, 65537, %v5422_v45  ;;  %vm5442_vm10 = vcmask 1043456  }
  0x4b   : > { %v4205_v24 = vcombine.low %v946_v11, %v947_v19 }
  0x4d   : > { %v981_v34 = vshrl.u32 %v4205_v24, 16 }
  0x50   : > { %751 = vmatmul.mubr.bf16.gmra.mrb[12].mxu0 %v564_v39 }
 0x10b   : > { %v3375_v46 = vpop.f32.mrb[0].mxu0 }
 0x10c   : > { %v3376_v47 = vpop.f32.mrb[1].mxu0 }
 0x10d   : > { %v3377_v49 = vadd.f32 %v3376_v47, %v3375_v46  ;;  %v3378_v50 = vpop.f32.mrb[2].mxu0  ;;  %v4124_v47 = vor.u32 %v969_v35, %v966_v26  ;;  %v984_v35 = vshll.u32 %v4205_v24, 16 }
 0x10e   : > { %v3379_v51 = vpop.f32.mrb[3].mxu0 }
 0x10f   : > { %v766_v54 = vmul.f32 %v3377_v49, %v4000_v48  ;;  %v3380_v55 = vadd.f32 %v3379_v51, %v3378_v50  ;;  %v945_v49 = vsel %vm937_vm14, 65537, %v5422_v45  ;;  %vm540_vm14 = vcmp.lt.s32.totalorder %v476_v23, 7 }
 0x110   : > { %vm940_vm1 = vmpackc.low %vm540_vm14, %vm540_vm14 }
 0x111   : > { %v767_v59 = vmul.f32 %v3380_v55, %v4000_v48  ;;  %v4014_v60 = vadd.f32 %v4005_v52, %v766_v54  ;;  %v4140_v54 = vcombine.low %v944_v36, %v945_v49  ;;  %v948_v26 = vsel %vm940_vm1, 65537, %v5422_v45 }
 0x112   : > { %v986_v55 = vrot.slane %v984_v35, 4 }
 0x113   : > { %5450 = vst [vmem:[#allocation11_spill] sm:$0xff] %v4014_v60  ;;  %v3381_v63 = vpop.f32.mrb[4].mxu0  ;;  %v4019_v0 = vadd.f32 %v4005_v52, %v767_v59  ;;  %v5417_v6 = vmax.f32 %v4014_v60, 0.0  ;;  %v972_v58 = vshrl.u32 %v4140_v54, 16  ;;  %v975_v59 = vshll.u32 %v4140_v54, 16  ;;  %v4480_v54 = vld [vmem:[%s5399_s4 + $0x100] sm:$0xff]  }
 0x114   : > { %v3382_v1 = vpop.f32.mrb[5].mxu0 }
 0x115   : > { %v3383_v4 = vadd.f32 %v3382_v1, %v3381_v63  ;;  %v3384_v5 = vpop.f32.mrb[6].mxu0  ;;  %v5419_v7 = vmax.f32 %v4019_v0, 0.0  ;;  %v4162_v63 = vcombine.low %v850_v31, %v851_v44  ;;  %v977_v10 = vrot.slane %v975_v59, 4 }
 0x116   : > { %v3385_v9 = vpop.f32.mrb[7].mxu0 }
 0x117   : > { %v768_v14 = vmul.f32 %v3383_v4, %v4000_v48  ;;  %v3386_v15 = vadd.f32 %v3385_v9, %v3384_v5  ;;  %v797_v16 = vpack.c.bf16 %v5419_v7, %v5417_v6  ;;  %v854_v4 = vsel %vm846_vm5, 65537, %v5422_v45 }
 0x118   : > { %v856_v5 = vsel %vm848_vm7, 65537, %v5422_v45  ;;  %v974_v9 = vrot.slane %v972_v58, 3  ;;  %vm5441_vm5 = vsmask.f32 7424  ;;  %vm998_vm7 = vcmp.ne.s16.totalorder %v4124_v47, 0 }
 0x119   : > { %v4060_v21 = vadd.f32 %v4005_v52, %v768_v14  ;;  %v769_v22 = vmul.f32 %v3386_v15, %v4000_v48  ;;  %805 = vrot.lane.b32.xlu0 %v797_v16, %s3799_s26  ;;  %v4220_v33 = vcombine.low %v856_v5, %v857_v18  ;;  %v885_v18 = vrot.slane %v883_v61, 5 }
 0x11a   : > { %v978_v30 = vor.u32 %v977_v10, %v974_v9 }
 0x11b   : > { %5459 = vst [vmem:[#allocation12_spill] sm:$0xff] %v4060_v21  ;;  %v4080_v28 = vadd.f32 %v4005_v52, %v769_v22  ;;  %v3387_v29 = vpop.f32.mrb[8].mxu0  ;;  %v5415_v37 = vmax.f32 %v4060_v21, 0.0  ;;  %v901_v9 = vshll.u32 %v4220_v33, 16 }
 0x11c   : > { %v3388_v32 = vpop.f32.mrb[9].mxu0 }
 0x11d   : > { %5462 = vst [vmem:[#allocation13_spill] sm:$0xff] %v4080_v28  ;;  %v5416_v38 = vmax.f32 %v4080_v28, 0.0  ;;  %v3389_v39 = vadd.f32 %v3388_v32, %v3387_v29  ;;  %v3390_v40 = vpop.f32.mrb[10].mxu0  ;;  %v949_v29 = vsel %vm941_vm3, 65537, %v5422_v45 }
 0x11e   : > { %v3391_v43 = vpop.f32.mrb[11].mxu0  ;;  %v4224_v36 = vcombine.low %v948_v26, %v949_v29  ;;  %v903_v26 = vrot.slane %v901_v9, 5 }
 0x11f   : > { %v770_v50 = vmul.f32 %v3389_v39, %v4000_v48  ;;  %v3392_v51 = vadd.f32 %v3391_v43, %v3390_v40  ;;  %v798_v53 = vpack.c.bf16 %v5416_v38, %v5415_v37  ;;  %v4228_v39 = vsel %vm962_vm2, %v4124_v47, %v978_v30 }
 0x120   : > { %v872_v43 = vshrl.u32 %v4162_v63, 16  ;;  %v990_v44 = vshrl.u32 %v4224_v36, 16  ;;  %vm999_vm9 = vcmp.ne.s16.totalorder %v4228_v39, 0 }
 0x121   : > { %v771_v56 = vmul.f32 %v3392_v51, %v4000_v48  ;;  %807 = vrot.lane.b32.xlu0 %v798_v53, %s3799_s26  ;;  %v4152_v57 = vadd.f32 %v4005_v52, %v770_v50  ;;  %v875_v50 = vshll.u32 %v4162_v63, 16  ;;  %v5425_v51 = vshll.u32 %v4224_v36, 16 }
 0x122   : > { %v898_v53 = vshrl.u32 %v4220_v33, 16  ;;  %v3688_v33 = vld [vmem:[%s5399_s4 + $0xa0] sm:$0xff]  }
 0x123   : > { %5473 = vst [vmem:[#allocation14_spill] sm:$0xff] %v4152_v57  ;;  %v3393_v1 = vpop.f32.mrb[12].mxu0  ;;  %v4168_v2 = vadd.f32 %v4005_v52, %v771_v56  ;;  %v5413_v15 = vmax.f32 %v4152_v57, 0.0  ;;  %v995_v5 = vrot.slane %v5425_v51, 4  ;;  %v877_v10 = vrot.slane %v875_v50, 5 }
 0x124   : > { %v3394_v8 = vpop.f32.mrb[13].mxu0  ;;  %v900_v11 = vrot.slane %v898_v53, 4 }
 0x125   : > { %5474 = vst [vmem:[#allocation15_spill] sm:$0xff] %v4168_v2  ;;  %v3395_v13 = vadd.f32 %v3394_v8, %v3393_v1  ;;  %v3396_v14 = vpop.f32.mrb[14].mxu0  ;;  %v5414_v16 = vmax.f32 %v4168_v2, 0.0  ;;  %v880_v1 = vshrl.u32 %v4233_v42, 16  ;;  %v874_v8 = vrot.slane %v872_v43, 4 }
 0x126   : > { %v3397_v17 = vpop.f32.mrb[15].mxu0  ;;  %v5477_v2 = vshll.u32 %v4224_v36, 16  ;;  %v3696_v36 = vld [vmem:[%s5399_s4 + $0xb8] sm:$0xff]  }
 0x127   : > { %v772_v20 = vmul.f32 %v3395_v13, %v4000_v48  ;;  %v3398_v22 = vadd.f32 %v3397_v17, %v3396_v14  ;;  %v799_v23 = vpack.c.bf16 %v5414_v16, %v5413_v15  ;;  %v4264_v14 = vor.u32 %v877_v10, %v874_v8  ;;  %v3664_v8 = vld [vmem:[%s5399_s4 + $0x48] sm:$0xff]  }
 0x128   : > { %v882_v17 = vrot.slane %v880_v1, 4  ;;  %v3665_v10 = vld [vmem:[%s5399_s4 + $0x8] sm:$0xff]  }
 0x129   : > { %v4216_v31 = vadd.f32 %v4005_v52, %v772_v20  ;;  %v773_v32 = vmul.f32 %v3398_v22, %v4000_v48  ;;  %809 = vrot.lane.b32.xlu1 %v799_v23, %s3799_s26  ;;  %v4235_v48 = vcombine.low %v854_v4, %v855_v25  ;;  %v992_v4 = vrot.slane %v990_v44, 3 }
 0x12a   : > { %v886_v25 = vor.u32 %v885_v18, %v882_v17  ;;  %v3668_v17 = vld [vmem:[%s5399_s4 + $0x58] sm:$0xff]   ;;  %v4317_v18 = vrot.slane %v875_v50, 1 }
 0x12b   : > { %5475 = vst [vmem:[#allocation16_spill] sm:$0xff] %v4216_v31  ;;  %v4231_v40 = vadd.f32 %v4005_v52, %v773_v32  ;;  %v5411_v46 = vmax.f32 %v4216_v31, 0.0  ;;  %v983_v52 = vrot.slane %v981_v34, 3  ;;  %v892_v63 = vshll.u32 %v4235_v48, 16 }
 0x12c   : > { %v889_v3 = vshrl.u32 %v4235_v48, 16  ;;  %v4271_v20 = vor.u32 %v995_v5, %v992_v4  ;;  %v3662_v4 = vld [vmem:[%s5399_s4 + $0x40] sm:$0xff]   ;;  %vm1022_vm6 = vcmp.ne.s16.totalorder %v4317_v18, 0  ;;  %v3680_v48 = vld [vmem:[%s5399_s4 + $0x78] sm:$0xff]  }
 0x12d   : > { %5476 = vst [vmem:[#allocation17_spill] sm:$0xff] %v4231_v40  ;;  %v5412_v49 = vmax.f32 %v4231_v40, 0.0  ;;  %v987_v13 = vor.u32 %v986_v55, %v983_v52  ;;  %v894_v23 = vrot.slane %v892_v63, 5  ;;  %v4287_v52 = vor.u32 %v903_v26, %v900_v11  ;;  %v3663_v5 = vld [vmem:[%s5399_s4] sm:$0xff]   ;;  %3399 = vmatprep.subr.bf16.mxu1 %v3662_v4  ;;  %v3666_v11 = vld [vmem:[%s5399_s4 + $0x50] sm:$0xff]  }
 0x12e   : > { %v891_v22 = vrot.slane %v889_v3, 4  ;;  %3400 = vmatpush3.bf16.msra.mxu1 %v3663_v5  ;;  %v916_v26 = vld [vmem:[#allocation2] sm:$0xf0] }
 0x12f   : > { %v800_v56 = vpack.c.bf16 %v5412_v49, %v5411_v46  ;;  %v4269_v19 = vsel %vm962_vm2, %v978_v30, %v987_v13  ;;  %v4281_v29 = vsel %vm962_vm2, %v987_v13, %v4271_v20  ;;  %v4285_v30 = vsel %vm5437_vm4, %v4264_v14, %v886_v25  ;;  %3401 = vmatprep.subr.bf16.mxu1 %v3664_v8  ;;  %v3667_v13 = vld [vmem:[%s5399_s4 + $0x10] sm:$0xff]   ;;  %v1008_v4 = vld [vmem:[#allocation2] sm:$0x80] }
 0x130   : > { %v895_v32 = vor.u32 %v894_v23, %v891_v22  ;;  %v1012_v22 = vor.u32 %v4317_v18, %v872_v43  ;;  %v1013_v23 = vrot.slane %v883_v61, 1  ;;  %v1072_v50 = vshll.u32 %v916_v26, 16  ;;  %v3670_v43 = vld [vmem:[%s5399_s4 + $0x60] sm:$0xff]  }
 0x131   : > { %811 = vrot.lane.b32.xlu1 %v800_v56, %s3799_s26  ;;  %v1027_v61 = vsel %vm1022_vm6, %v1008_v4, 0  ;;  %v3671_v8 = vld [vmem:[%s5399_s4 + $0x20] sm:$0xff]   ;;  %vm1000_vm13 = vcmp.ne.s16.totalorder %v4269_v19, 0  ;;  %vm5432_vm3 = vcmp.ne.s16.totalorder %v4281_v29, 0 }
 0x132   : > { %v4290_v55 = vsel %vm5437_vm4, %v886_v25, %v895_v32  ;;  %v4294_v56 = vsel %vm5437_vm4, %v895_v32, %v4287_v52  ;;  %3402 = vmatpush3.bf16.msra.mxu1 %v3665_v10  ;;  %v3669_v32 = vld [vmem:[%s5399_s4 + $0x18] sm:$0xff]   ;;  %v4326_v5 = vsel %vm5441_vm5, %v1012_v22, %v1013_v23  ;;  %v1070_v10 = vshrl.u32 %v916_v26, 16 }
 0x133   : > { %3403 = vmatprep.subr.bf16.mxu1 %v3666_v11  ;;  %vm5421_vm8 = vcmp.ne.s16.totalorder %v4326_v5, 0  ;;  %v1003_v11 = vsel %vm998_vm7, %v916_v26, 0  ;;  %v1016_v22 = vrot.slane %v892_v63, 1  ;;  %v1139_v4 = vrot.slane %v1027_v61, 4  ;;  %v3673_v26 = vld [vmem:[%s5399_s4 + $0x28] sm:$0xff]  }
 0x136   : > { %3404 = vmatpush3.bf16.msra.mxu1 %v3667_v13  ;;  %v1074_v13 = vrot.slane %v1072_v50, 1  ;;  %v3674_v50 = vld [vmem:[%s5399_s4 + $0xc0] sm:$0xff]  }
 0x137   : > { %3405 = vmatprep.subr.bf16.mxu1 %v3668_v17  ;;  %v1015_v17 = vor.u32 %v1013_v23, %v880_v1  ;;  %v1124_v23 = vrot.slane %v1003_v11, 1  ;;  %v3675_v11 = vld [vmem:[%s5399_s4 + $0x80] sm:$0xff]   ;;  %3439 = vmatprep.subr.bf16.mxu0 %v3674_v50  ;;  %v3679_v50 = vld [vmem:[%s5399_s4 + $0x88] sm:$0xff]  }
 0x138   : > { %3440 = vmatpush3.bf16.msra.mxu0 %v3675_v11 }
 0x139   : > { %v4374_v46 = vsel %vm5441_vm5, %v1015_v17, %v1016_v22  ;;  %v4389_v17 = vrot.slane %v964_v12, 7  ;;  %v4405_v12 = vrot.slane %v901_v9, 1 }
 0x13a   : > { %3406 = vmatpush3.bf16.msra.mxu1 %v3669_v32  ;;  %vm5420_vm12 = vcmp.ne.s16.totalorder %v4374_v46, 0 }
 0x13b   : > { %3407 = vmatprep.subr.bf16.mxu1 %v3670_v43  ;;  %v3672_v43 = vld [vmem:[%s5399_s4 + $0x68] sm:$0xff]  }
 0x13e   : > { %3408 = vmatpush3.bf16.msra.mxu1 %v3671_v8 }
 0x13f   : > { %3409 = vmatprep.subr.bf16.mxu1 %v3672_v43  ;;  %v3678_v43 = vld [vmem:[%s5399_s4 + $0xc8] sm:$0xff]  }
 0x140   : > { %3441 = vmatprep.subr.bf16.mxu0 %v3678_v43  ;;  %v4430_v43 = vrot.slane %v972_v58, 7  ;;  %v3683_v58 = vld [vmem:[%s5399_s4 + $0x90] sm:$0xff]  }
 0x141   : > { %3442 = vmatpush3.bf16.msra.mxu0 %v3679_v50  ;;  %v4442_v50 = vor.u32 %v4389_v17, %v967_v27 }
 0x142   : > { %3410 = vmatpush3.bf16.msra.mxu1 %v3673_v26 }
 0x143   : > { %vm1045_vm1 = vcmp.ne.s16.totalorder %v4442_v50, 0  ;;  %v3704_v50 = vld [vmem:[%s5402_s7 + $0x50] sm:$0xff]  }
 0x18b   : > { %v806_v25 = vpop.permute.xlu0 %805 }
 0x18c   : > { %817 = vst.msk [vmem:[#allocation2 + $0x8] sm:$0xff] %vm415_vm0, %v806_v25 }
 0x193   : > { %v808_v25 = vpop.permute.xlu0 %807  ;;  %v4345_v32 = vld [vmem:[#allocation2 + $0x8] sm:$0xff] }
 0x194   : > { %818 = vst.msk [vmem:[#allocation2 + $0x10] sm:$0xff] %vm415_vm0, %v808_v25  ;;  %v4354_v42 = vsel %vm5421_vm8, %v4345_v32, 0  ;;  %v1077_v1 = vshll.u32 %v4345_v32, 16  ;;  %v1081_v63 = vshrl.u32 %v4345_v32, 16  ;;  %v4368_v8 = vsel %vm999_vm9, %v4345_v32, 0 }
 0x195   : > { %v1140_v61 = vrot.slane %v4354_v42, 4  ;;  %v1075_v25 = vor.u32 %v1074_v13, %v1070_v10  ;;  %v1125_v49 = vrot.slane %v4368_v8, 1  ;;  %v3676_v42 = vld [vmem:[%s5399_s4 + $0x70] sm:$0xff]   ;;  %v1050_v45 = vsel %vm1045_vm1, %v4345_v32, 0 }
 0x196   : > { %v1079_v16 = vrot.slane %v1077_v1, 1  ;;  %v1158_v10 = vrot.slane %v1081_v63, 4  ;;  %v1159_v13 = vrot.slane %v1077_v1, 5  ;;  %3411 = vmatprep.subr.bf16.mxu1 %v3676_v42 }
 0x197   : > { %v1141_v15 = vsel %vm5442_vm10, %v1139_v4, %v1140_v61  ;;  %v4392_v26 = vsel %vm1123_vm11, %v1124_v23, %v1125_v49  ;;  %v3677_v4 = vld [vmem:[%s5399_s4 + $0x30] sm:$0xff]   ;;  %v4409_v23 = vld [vmem:[#allocation2 + $0x8] sm:$0xf0] }
 0x198   : > { %1148 = vrot.lane.b32.xlu0 %v1141_v15, %s3800_s15  ;;  %v1018_v15 = vor.u32 %v1016_v22, %v889_v3  ;;  %v4407_v1 = vor.u32 %v1159_v13, %v1158_v10  ;;  %3412 = vmatpush3.bf16.msra.mxu1 %v3677_v4  ;;  %v1080_v11 = vsel %vm5441_vm5, %v1075_v25, %v1079_v16  ;;  %v3682_v3 = vld [vmem:[%s5399_s4 + $0xd0] sm:$0xff]   ;;  %v3681_v10 = vld [vmem:[%s5399_s4 + $0x38] sm:$0xff]   ;;  %v1064_v62 = vsel %vm998_vm7, %v4409_v23, 0 }
 0x199   : > { %3413 = vmatprep.subr.bf16.mxu1 %v3680_v48  ;;  %3443 = vmatprep.subr.bf16.mxu0 %v3682_v3  ;;  %v1037_v3 = vor.u32 %v4430_v43, %v975_v59  ;;  %v1206_v7 = vshll.u32 %v4409_v23, 16 }
 0x19a   : > { %v4437_v4 = vsel %vm5441_vm5, %v1018_v15, %v4405_v12  ;;  %3444 = vmatpush3.bf16.msra.mxu0 %v3683_v58 }
 0x19b   : > { %v810_v8 = vpop.permute.xlu1 %809  ;;  %v4413_v42 = vld [vmem:[#allocation2 + $0x10] sm:$0xff]  ;;  %vm5418_vm14 = vcmp.ne.s16.totalorder %v4437_v4, 0  ;;  %v1208_v51 = vrot.slane %v1206_v7, 1 }
 0x19c   : > { %819 = vst.msk [vmem:[#allocation2 + $0x18] sm:$0xff] %vm415_vm0, %v810_v8  ;;  %1108 = vrot.lane.b32.xlu0 %v1080_v11, %s3800_s15  ;;  %v1029_v9 = vsel %vm5420_vm12, %v4413_v42, 0  ;;  %v1085_v22 = vshll.u32 %v4413_v42, 16  ;;  %v1089_v25 = vshrl.u32 %v4413_v42, 16  ;;  %v1005_v8 = vsel %vm1000_vm13, %v4413_v42, 0  ;;  %3414 = vmatpush3.bf16.msra.mxu1 %v3681_v10  ;;  %v3692_v7 = vld [vmem:[%s5399_s4 + $0xf0] sm:$0xff]  }
 0x19d   : > { %v1142_v13 = vrot.slane %v1029_v9, 4  ;;  %v1127_v37 = vrot.slane %v1005_v8, 1  ;;  %v1065_v48 = vsel %vm999_vm9, %v4413_v42, 0  ;;  %v3686_v8 = vld [vmem:[%s5399_s4 + $0x98] sm:$0xff]   ;;  %3533 = vmatprep.subr.bf16.mxu1 %v4480_v54 }
 0x19e   : > { %v1162_v11 = vrot.slane %v1085_v22, 5  ;;  %v1161_v9 = vrot.slane %v1089_v25, 4  ;;  %v4454_v15 = vrot.slane %v1085_v22, 1  ;;  %v1083_v22 = vor.u32 %v1081_v63, %v1079_v16 }
 0x19f   : > { %v1143_v27 = vsel %vm5442_vm10, %v1140_v61, %v1142_v13  ;;  %v4465_v10 = vsel %vm1123_vm11, %v1125_v49, %v1127_v37  ;;  %v3685_v61 = vld [vmem:[%s5399_s4 + $0xd8] sm:$0xff]   ;;  %v1236_v38 = vrot.slane %v1065_v48, 1  ;;  %v4488_v63 = vrot.slane %v981_v34, 7 }
 0x1a0   : > { %1150 = vrot.lane.b32.xlu1 %v1143_v27, %s3800_s15  ;;  %v1163_v58 = vor.u32 %v1162_v11, %v1161_v9  ;;  %v1235_v27 = vrot.slane %v1064_v62, 1  ;;  %3445 = vmatprep.subr.bf16.mxu0 %v3685_v61  ;;  %v1088_v16 = vsel %vm5441_vm5, %v1083_v22, %v4454_v15  ;;  %v4506_v61 = vsel %vm1033_vm15, %v4389_v17, %v1037_v3  ;;  %v3687_v17 = vld [vmem:[%s5399_s4 + $0xe0] sm:$0xff]  }
 0x1a1   : > { %3446 = vmatpush3.bf16.msra.mxu0 %v3686_v8  ;;  %v1091_v8 = vor.u32 %v1089_v25, %v4454_v15  ;;  %vm1046_vm8 = vcmp.ne.s16.totalorder %v4506_v61, 0 }
 0x1a2   : > { %v4492_v11 = vsel %vm5437_vm4, %v4407_v1, %v1163_v58  ;;  %v4495_v9 = vsel %vm1123_vm11, %v1235_v27, %v1236_v38  ;;  %v4513_v27 = vor.u32 %v4405_v12, %v898_v53  ;;  %v1040_v12 = vor.u32 %v4488_v63, %v984_v35  ;;  %3447 = vmatprep.subr.bf16.mxu0 %v3687_v17 }
 0x1a3   : > { %v812_v59 = vpop.permute.xlu1 %811  ;;  %v4484_v49 = vld [vmem:[#allocation2 + $0x18] sm:$0xff] }
 0x1a4   : > { %820 = vst.msk [vmem:[#allocation2 + $0x20] sm:$0xff] %vm415_vm0, %v812_v59  ;;  %1110 = vrot.lane.b32.xlu1 %v1088_v16, %s3800_s15  ;;  %v1030_v62 = vsel %vm5418_vm14, %v4484_v49, 0  ;;  %v1093_v48 = vshll.u32 %v4484_v49, 16  ;;  %v1097_v34 = vshrl.u32 %v4484_v49, 16  ;;  %v4518_v59 = vsel %vm5432_vm3, %v4484_v49, 0 }
 0x1a5   : > { %v1144_v22 = vrot.slane %v1030_v62, 4  ;;  %v5424_v62 = vrot.slane %v4518_v59, 1  ;;  %vm1002_vm14 = vcmp.ne.s16.totalorder %v4271_v20, 0  ;;  %v4535_v25 = vsel %vm1000_vm13, %v4484_v49, 0  ;;  %3448 = vmatpush3.bf16.msra.mxu0 %v3688_v33  ;;  %v3691_v33 = vld [vmem:[%s5399_s4 + $0xa8] sm:$0xff]   ;;  %v3715_v20 = vld [vmem:[%s5402_s7 + $0x38] sm:$0xff]  }
 0x1a6   : > { %v1095_v3 = vrot.slane %v1093_v48, 1  ;;  %v1166_v16 = vrot.slane %v1093_v48, 5  ;;  %v1165_v6 = vrot.slane %v1097_v34, 4  ;;  %v1238_v35 = vrot.slane %v4535_v25, 1 }
 0x1a7   : > { %v1145_v53 = vsel %vm5442_vm10, %v1142_v13, %v1144_v22  ;;  %v4543_v24 = vsel %vm1123_vm11, %v1127_v37, %v5424_v62  ;;  %v1063_v13 = vld [vmem:[#allocation2 + $0x28] sm:$0x1f]  ;;  %vm5431_vm12 = vcmp.ne.s16.totalorder %v4513_v27, 0  ;;  %v4556_v37 = vrot.slane %v990_v44, 7 }
 0x1a8   : > { %1152 = vrot.lane.b32.xlu0 %v1145_v53, %s3800_s15  ;;  %v1096_v48 = vsel %vm5441_vm5, %v1091_v8, %v1095_v3  ;;  %v3690_v8 = vld [vmem:[%s5399_s4 + $0xe8] sm:$0xff]   ;;  %v4552_v17 = vor.u32 %v1166_v16, %v1165_v6  ;;  %v1239_v53 = vsel %vm1123_vm11, %v1236_v38, %v1238_v35  ;;  %v4571_v6 = vsel %vm1033_vm15, %v4430_v43, %v1040_v12 }
 0x1a9   : > { %1112 = vrot.lane.b32.xlu1 %v1096_v48, %s3800_s15  ;;  %3449 = vmatprep.subr.bf16.mxu0 %v3690_v8  ;;  %v1068_v38 = vsel %vm1002_vm14, %v1063_v13, 0  ;;  %v4588_v43 = vsel %vm1046_vm8, %v4413_v42, 0  ;;  %v4591_v12 = vor.u32 %v1097_v34, %v1095_v3  ;;  %v1436_v34 = vshrl.u32 %v4495_v9, 16 }
 0x1aa   : > { %v4575_v44 = vsel %vm5437_vm4, %v1163_v58, %v4552_v17  ;;  %3450 = vmatpush3.bf16.msra.mxu0 %v3691_v33  ;;  %v3693_v33 = vld [vmem:[%s5399_s4 + $0xb0] sm:$0xff]   ;;  %v1439_v3 = vshll.u32 %v4495_v9, 16  ;;  %v1204_v13 = vshrl.u32 %v4409_v23, 16  ;;  %v4608_v57 = vrot.slane %v1068_v38, 1  ;;  %v3695_v38 = vld [vmem:[%s5399_s4 + $0xf8] sm:$0xff]  }
 0x1ab   : > { %v4562_v25 = vld [vmem:[#allocation2 + $0x20] sm:$0xff]  ;;  %3451 = vmatprep.subr.bf16.mxu0 %v3692_v7  ;;  %v1043_v9 = vor.u32 %v4556_v37, %v5477_v2  ;;  %v1184_v23 = vrot.slane %v1050_v45, 5  ;;  %v1438_v2 = vrot.slane %v1436_v34, 3 }
 0x1ac   : > { %v4564_v48 = vld [vmem:[#allocation2 + $0x20] sm:$0xf]  ;;  %v4582_v16 = vsel %vm5431_vm12, %v4562_v25, 0  ;;  %v1067_v8 = vsel %vm5432_vm3, %v4562_v25, 0  ;;  %v1173_v31 = vshll.u32 %v4562_v25, 16  ;;  %vm1183_vm12 = vcmask 1042432  }
 0x1ad   : > { %v1101_v62 = vshll.u32 %v4564_v48, 16  ;;  %v1146_v58 = vrot.slane %v4582_v16, 4  ;;  %v1240_v40 = vrot.slane %v1067_v8, 1  ;;  %vm5440_vm3 = vcmp.ne.s16.totalorder %v4571_v6, 0 }
 0x1ae   : > { %v1185_v8 = vrot.slane %v4588_v43, 5  ;;  %3452 = vmatpush3.bf16.msra.mxu0 %v3693_v33  ;;  %v5478_v7 = vshrl.u32 %v4562_v25, 16  ;;  %v1175_v21 = vrot.slane %v1173_v31, 5  ;;  %v1441_v28 = vrot.slane %v1439_v3, 4 }
 0x1af   : > { %v1103_v41 = vrot.slane %v1101_v62, 1  ;;  %v1147_v16 = vsel %vm5442_vm10, %v1144_v22, %v1146_v58  ;;  %v1209_v22 = vor.u32 %v1208_v51, %v1204_v13  ;;  %3453 = vmatprep.subr.bf16.mxu0 %v3695_v38  ;;  %v1447_v51 = vshll.u32 %v1239_v53, 16 }
 0x1b0   : > { %1154 = vrot.lane.b32.xlu0 %v1147_v16, %s3800_s15  ;;  %v1172_v16 = vrot.slane %v5478_v7, 4  ;;  %v1241_v43 = vsel %vm1123_vm11, %v1238_v35, %v1240_v40  ;;  %v1243_v13 = vsel %vm1123_vm11, %v1240_v40, %v4608_v57  ;;  %v4635_v33 = vsel %vm1033_vm15, %v4488_v63, %v1043_v9 }
 0x1b1   : > { %v1104_v62 = vsel %vm5441_vm5, %v4591_v12, %v1103_v41  ;;  %v1210_v45 = vsel %vm5441_vm5, %v1209_v22, %v4454_v15  ;;  %v1485_v3 = vshrl.u32 %v1241_v43, 16  ;;  %v4640_v15 = vld [vmem:[#allocation2 + $0x28] sm:$0xf]  ;;  %v1488_v35 = vshll.u32 %v1241_v43, 16 }
 0x1b2   : > { %1114 = vrot.lane.b32.xlu1 %v1104_v62, %s3800_s15  ;;  %v1444_v62 = vshrl.u32 %v1239_v53, 16  ;;  %v4637_v7 = vor.u32 %v1175_v21, %v1172_v16  ;;  %3454 = vmatpush3.bf16.msra.mxu0 %v3696_v36  ;;  %v1449_v53 = vrot.slane %v1447_v51, 4  ;;  %v1526_v22 = vshrl.u32 %v1243_v13, 16 }
 0x1b3   : > { %v1529_v38 = vshll.u32 %v1243_v13, 16  ;;  %v1186_v40 = vsel %vm1183_vm12, %v1184_v23, %v1185_v8  ;;  %v1442_v21 = vor.u32 %v1441_v28, %v1438_v2  ;;  %v1487_v9 = vrot.slane %v1485_v3, 3 }
 0x1b4   : > { %1222 = vrot.lane.b32.xlu0 %v1210_v45, %s3800_s15  ;;  %v1446_v34 = vrot.slane %v1444_v62, 3  ;;  %v4646_v63 = vsel %vm5437_vm4, %v4552_v17, %v4637_v7  ;;  %v1490_v62 = vrot.slane %v1488_v35, 4  ;;  %v1528_v45 = vrot.slane %v1526_v22, 3 }
 0x1b5   : > { %v1531_v60 = vrot.slane %v1529_v38, 4  ;;  %v1105_v36 = vshrl.u32 %v4564_v48, 16  ;;  %v1211_v51 = vrot.slane %v1173_v31, 1  ;;  %v1215_v43 = vshll.u32 %v4640_v15, 16  ;;  %v1032_v38 = vld [vmem:[#allocation2 + $0x28] sm:$0x1] }
 0x1b6   : > { %1193 = vrot.lane.b32.xlu1 %v1184_v23, %s3800_s15  ;;  %v1450_v16 = vor.u32 %v1449_v53, %v1446_v34  ;;  %v1052_v23 = vsel %vm5440_vm3, %v4484_v49, 0  ;;  %vm5439_vm15 = vcmp.ne.s16.totalorder %v4635_v33, 0  ;;  %v1491_v17 = vor.u32 %v1490_v62, %v1487_v9 }
 0x1b7   : > { %v4659_v2 = vor.u32 %v1531_v60, %v1528_v45  ;;  %v1107_v13 = vor.u32 %v1105_v36, %v1103_v41  ;;  %v1187_v34 = vrot.slane %v1052_v23, 5  ;;  %v5479_v53 = vshrl.u32 %v4562_v25, 16 }
 0x1b8   : > { %1195 = vrot.lane.b32.xlu0 %v1186_v40, %s3800_s15  ;;  %v4657_v28 = vsel %vm962_vm2, %v1442_v21, %v1450_v16  ;;  %v4662_v31 = vsel %vm962_vm2, %v1450_v16, %v1491_v17  ;;  %v1217_v22 = vrot.slane %v1215_v43, 1  ;;  %v1053_v41 = vsel %vm5439_vm15, %v4562_v25, 0 }
 0x1b9   : > { %v4666_v3 = vsel %vm962_vm2, %v1491_v17, %v4659_v2  ;;  %v1213_v35 = vor.u32 %v1211_v51, %v5479_v53  ;;  %v1219_v60 = vshrl.u32 %v4640_v15, 16  ;;  %vm5438_vm4 = vcmp.ne.s16.totalorder %v4556_v37, 0 }
 0x1ba   : > { %1156 = vrot.lane.b32.xlu1 %v1146_v58, %s3800_s15  ;;  %v1212_v58 = vsel %vm5441_vm5, %v4591_v12, %v1211_v51  ;;  %v1188_v40 = vsel %vm1183_vm12, %v1185_v8, %v1187_v34  ;;  %v1189_v21 = vrot.slane %v1053_v41, 5  ;;  %v1054_v9 = vsel %vm5438_vm4, %v1032_v38, 0  ;;  %v821_v51 = vld [vmem:[#allocation2] sm:$0xf8] }
 0x1bb   : > { %v1218_v12 = vsel %vm5441_vm5, %v1213_v35, %v1217_v22  ;;  %v1221_v16 = vor.u32 %v1219_v60, %v1217_v22  ;;  %v1191_v45 = vrot.slane %v1054_v9, 5  ;;  %vm906_vm4 = vcmp.ne.s16.totalorder %v4264_v14, 0 }
 0x1bc   : > { %1116 = vrot.lane.b32.xlu0 %v1107_v13, %s3800_s15  ;;  %v1190_v62 = vsel %vm1183_vm12, %v1187_v34, %v1189_v21  ;;  %v911_v43 = vsel %vm906_vm4, %v821_v51, 0  ;;  %vm907_vm15 = vcmp.ne.s16.totalorder %v4285_v30, 0  ;;  %vm908_vm3 = vcmp.ne.s16.totalorder %v4290_v55, 0  ;;  %v917_v51 = vld [vmem:[#allocation2 + $0x20] sm:$0x1f] }
 0x1bd   : > { %v1192_v8 = vsel %vm1183_vm12, %v1189_v21, %v1191_v45  ;;  %v912_v9 = vsel %vm907_vm15, %v4345_v32, 0  ;;  %vm909_vm5 = vcmp.ne.s16.totalorder %v4294_v56, 0  ;;  %vm5443_vm10 = vcmp.ne.s16.totalorder %v4287_v52, 0 }
 0x1be   : > { %1224 = vrot.lane.b32.xlu1 %v1212_v58, %s3800_s15 }
 0x1c0   : > { %1197 = vrot.lane.b32.xlu0 %v1188_v40, %s3800_s15 }
 0x1c2   : > { %1226 = vrot.lane.b32.xlu1 %v1218_v12, %s3800_s15 }
 0x1c4   : > { %1199 = vrot.lane.b32.xlu0 %v1190_v62, %s3800_s15 }
 0x1c6   : > { %1228 = vrot.lane.b32.xlu1 %v1221_v16, %s3800_s15 }
 0x1c8   : > { %1201 = vrot.lane.b32.xlu0 %v1192_v8, %s3800_s15 }
 0x20a   : > { %v1149_v36 = vpop.permute.xlu0 %1148 }
 0x20b   : > { %v1261_v23 = vsel %vm415_vm0, %v4392_v26, %v1149_v36 }
 0x20c   : > { %v1390_v13 = vshrl.u32 %v1261_v23, 16  ;;  %v1393_v34 = vshll.u32 %v1261_v23, 16 }
 0x20e   : > { %v1109_v17 = vpop.permute.xlu0 %1108  ;;  %v1392_v22 = vrot.slane %v1390_v13, 3  ;;  %v1395_v41 = vrot.slane %v1393_v34, 4 }
 0x20f   : > { %v1246_v58 = vsel %vm415_vm0, %v911_v43, %v1109_v17 }
 0x210   : > { %v1375_v38 = vshrl.u32 %v1246_v58, 16  ;;  %v1378_v40 = vshll.u32 %v1246_v58, 16  ;;  %v1396_v8 = vor.u32 %v1395_v41, %v1392_v22  ;;  %v4712_v22 = vsel %vm1002_vm14, %v917_v51, 0 }
 0x212   : > { %v1151_v53 = vpop.permute.xlu1 %1150  ;;  %v1377_v23 = vrot.slane %v1375_v38, 3  ;;  %v1380_v43 = vrot.slane %v1378_v40, 4 }
 0x213   : > { %v1264_v35 = vsel %vm415_vm0, %v4465_v10, %v1151_v53 }
 0x214   : > { %v1397_v60 = vshrl.u32 %v1264_v35, 16  ;;  %v1400_v26 = vshll.u32 %v1264_v35, 16  ;;  %v913_v35 = vsel %vm908_vm3, %v4413_v42, 0  ;;  %v1381_v40 = vor.u32 %v1380_v43, %v1377_v23 }
 0x216   : > { %v1399_v21 = vrot.slane %v1397_v60, 3  ;;  %v1402_v12 = vrot.slane %v1400_v26, 4  ;;  %v1111_v16 = vpop.permute.xlu1 %1110 }
 0x217   : > { %v1249_v62 = vsel %vm415_vm0, %v912_v9, %v1111_v16  ;;  %v1058_v16 = vsel %vm907_vm15, %v4413_v42, 0 }
 0x218   : > { %v1382_v10 = vshrl.u32 %v1249_v62, 16  ;;  %v1385_v45 = vshll.u32 %v1249_v62, 16  ;;  %v1403_v36 = vor.u32 %v1402_v12, %v1399_v21  ;;  %v1131_v62 = vrot.slane %v4712_v22, 1 }
 0x21a   : > { %v1384_v17 = vrot.slane %v1382_v10, 3  ;;  %v1387_v13 = vrot.slane %v1385_v45, 4  ;;  %v1153_v34 = vpop.permute.xlu0 %1152  ;;  %v1404_v58 = vsel %vm962_vm2, %v1396_v8, %v1403_v36  ;;  %v3689_v10 = vld [vmem:[%s5399_s4 + $0x108] sm:$0xff]  }
 0x21b   : > { %v1267_v32 = vsel %vm415_vm0, %v4543_v24, %v1153_v34  ;;  %v1113_v53 = vpop.permute.xlu1 %1112  ;;  %1851 = vmatprep.mubr.bf16.mxu1 %v1404_v58  ;;  %v5480_v34 = vrot.slane %v4518_v59, 1 }
 0x21c   : > { %v1388_v41 = vor.u32 %v1387_v13, %v1384_v17  ;;  %v1460_v60 = vshrl.u32 %v1267_v32, 16  ;;  %v1463_v26 = vshll.u32 %v1267_v32, 16  ;;  %v1252_v38 = vsel %vm415_vm0, %v913_v35, %v1113_v53  ;;  %v1055_v35 = vld [vmem:[#allocation2 + $0x8] sm:$0xf8] }
 0x21d   : > { %v1452_v21 = vshrl.u32 %v1252_v38, 16  ;;  %v1455_v12 = vshll.u32 %v1252_v38, 16  ;;  %v1293_v45 = vsel %vm415_vm0, %v1058_v16, %v1113_v53  ;;  %v1132_v58 = vsel %vm1123_vm11, %v5480_v34, %v1131_v62 }
 0x21e   : > { %v1462_v9 = vrot.slane %v1460_v60, 3  ;;  %v1465_v24 = vrot.slane %v1463_v26, 4  ;;  %v1389_v23 = vsel %vm962_vm2, %v1381_v40, %v1388_v41  ;;  %v1427_v42 = vshrl.u32 %v1293_v45, 16  ;;  %v3694_v60 = vld [vmem:[%s5399_s4 + $0x110] sm:$0xff]  }
 0x21f   : > { %v1454_v8 = vrot.slane %v1452_v21, 3  ;;  %v1457_v51 = vrot.slane %v1455_v12, 4  ;;  %1852 = vmatmul.mubr.bf16.vlgmr.msra.gmra.mrb[0].mxu1 %v1389_v23  ;;  %v1430_v13 = vshll.u32 %v1293_v45, 16 }
 0x220   : > { %v1466_v43 = vor.u32 %v1465_v24, %v1462_v9  ;;  %3534 = vmatpush3.bf16.msra.mxu1 %v4480_v54  ;;  %v914_v54 = vsel %vm909_vm5, %v4484_v49, 0  ;;  %v1057_v24 = vsel %vm906_vm4, %v1055_v35, 0  ;;  %v1429_v16 = vrot.slane %v1427_v42, 3 }
 0x221   : > { %v1458_v17 = vor.u32 %v1457_v51, %v1454_v8  ;;  %3535 = vmatprep.subr.bf16.mxu1 %v3689_v10  ;;  %v1432_v45 = vrot.slane %v1430_v13, 4 }
 0x222   : > { %v1155_v32 = vpop.permute.xlu0 %1154  ;;  %v1467_v53 = vsel %vm962_vm2, %v1403_v36, %v1466_v43 }
 0x223   : > { %v1270_v26 = vsel %vm415_vm0, %v1132_v58, %v1155_v32  ;;  %1859 = vmatprep.mubr.bf16.mxu1 %v1467_v53  ;;  %v1459_v59 = vsel %vm962_vm2, %v1388_v41, %v1458_v17  ;;  %v3697_v41 = vld [vmem:[%s5399_s4 + $0x118] sm:$0xff]  }
 0x224   : > { %v1115_v38 = vpop.permute.xlu1 %1114  ;;  %v1501_v40 = vshrl.u32 %v1270_v26, 16  ;;  %v1504_v21 = vshll.u32 %v1270_v26, 16  ;;  %3536 = vmatpush3.bf16.msra.mxu1 %v3689_v10 }
 0x225   : > { %v1255_v36 = vsel %vm415_vm0, %v914_v54, %v1115_v38  ;;  %3537 = vmatprep.subr.bf16.mxu1 %v3694_v60 }
 0x226   : > { %v1493_v12 = vshrl.u32 %v1255_v36, 16  ;;  %v1496_v9 = vshll.u32 %v1255_v36, 16  ;;  %v1503_v8 = vrot.slane %v1501_v40, 3  ;;  %v1506_v51 = vrot.slane %v1504_v21, 4  ;;  %v1223_v23 = vpop.permute.xlu0 %1222 }
 0x227   : > { %v1291_v32 = vsel %vm415_vm0, %v1057_v24, %v1223_v23  ;;  %1860 = vmatmul.mubr.bf16.gmra.mrb[4].mxu1 %v1459_v59  ;;  %v4752_v40 = vor.u32 %v1432_v45, %v1429_v16 }
 0x228   : > { %v1495_v34 = vrot.slane %v1493_v12, 3  ;;  %v1498_v58 = vrot.slane %v1496_v9, 4  ;;  %v1194_v53 = vpop.permute.xlu1 %1193  ;;  %v1507_v26 = vor.u32 %v1506_v51, %v1503_v8  ;;  %v1420_v54 = vshrl.u32 %v1291_v32, 16  ;;  %3538 = vmatpush3.bf16.msra.mxu1 %v3694_v60 }
 0x229   : > { %v1423_v38 = vshll.u32 %v1291_v32, 16  ;;  %v1276_v10 = vsel %vm415_vm0, %v4407_v1, %v1194_v53  ;;  %3539 = vmatprep.subr.bf16.mxu1 %v3697_v41 }
 0x22a   : > { %v4749_v42 = vor.u32 %v1498_v58, %v1495_v34  ;;  %v1405_v13 = vshrl.u32 %v1276_v10, 16  ;;  %v1408_v35 = vshll.u32 %v1276_v10, 16  ;;  %v1422_v21 = vrot.slane %v1420_v54, 3  ;;  %v1196_v12 = vpop.permute.xlu0 %1195 }
 0x22b   : > { %v1425_v36 = vrot.slane %v1423_v38, 4  ;;  %v1508_v9 = vsel %vm962_vm2, %v1466_v43, %v1507_v26  ;;  %v1279_v1 = vsel %vm415_vm0, %v4492_v11, %v1196_v12  ;;  %v1059_v58 = vsel %vm908_vm3, %v4484_v49, 0 }
 0x22c   : > { %v1407_v24 = vrot.slane %v1405_v13, 3  ;;  %v1410_v8 = vrot.slane %v1408_v35, 4  ;;  %v1157_v59 = vpop.permute.xlu1 %1156  ;;  %1867 = vmatprep.mubr.bf16.mxu1 %v1508_v9  ;;  %v1500_v51 = vsel %vm962_vm2, %v1458_v17, %v4749_v42  ;;  %v1412_v60 = vshrl.u32 %v1279_v1, 16  ;;  %3540 = vmatpush3.bf16.msra.mxu1 %v3697_v41 }
 0x22d   : > { %v1426_v23 = vor.u32 %v1425_v36, %v1422_v21  ;;  %v1415_v16 = vshll.u32 %v1279_v1, 16  ;;  %v1273_v45 = vsel %vm415_vm0, %v1131_v62, %v1157_v59  ;;  %v915_v17 = vsel %vm5443_vm10, %v4564_v48, 0 }
 0x22e   : > { %v1542_v34 = vshrl.u32 %v1273_v45, 16  ;;  %v1545_v43 = vshll.u32 %v1273_v45, 16  ;;  %v1414_v11 = vrot.slane %v1412_v60, 3  ;;  %v1117_v53 = vpop.permute.xlu0 %1116  ;;  %v1411_v22 = vor.u32 %v1410_v8, %v1407_v24 }
 0x22f   : > { %v1417_v32 = vrot.slane %v1415_v16, 4  ;;  %v1434_v54 = vsel %vm962_vm2, %v1426_v23, %v4752_v40  ;;  %v1258_v10 = vsel %vm415_vm0, %v915_v17, %v1117_v53  ;;  %1868 = vmatmul.mubr.bf16.gmra.mrb[8].mxu1 %v1500_v51  ;;  %v1060_v24 = vsel %vm909_vm5, %v4562_v25, 0 }
 0x230   : > { %v1544_v38 = vrot.slane %v1542_v34, 3  ;;  %v1547_v62 = vrot.slane %v1545_v43, 4  ;;  %v1225_v13 = vpop.permute.xlu1 %1224  ;;  %1916 = vmatprep.mubr.bf16.mxu0 %v1434_v54  ;;  %v1534_v49 = vshrl.u32 %v1258_v10, 16  ;;  %v1537_v41 = vshll.u32 %v1258_v10, 16 }
 0x231   : > { %v1418_v35 = vor.u32 %v1417_v32, %v1414_v11  ;;  %v1296_v21 = vsel %vm415_vm0, %v1059_v58, %v1225_v13  ;;  %v1061_v53 = vsel %vm5443_vm10, %v4640_v15, 0  ;;  %vm418_vm10 = vcmask 261120  }
 0x232   : > { %v1548_v36 = vor.u32 %v1547_v62, %v1544_v38  ;;  %v1476_v12 = vshrl.u32 %v1296_v21, 16  ;;  %v1479_v48 = vshll.u32 %v1296_v21, 16  ;;  %v1536_v9 = vrot.slane %v1534_v49, 3  ;;  %v1198_v59 = vpop.permute.xlu0 %1197 }
 0x233   : > { %v1539_v1 = vrot.slane %v1537_v41, 4  ;;  %v1419_v8 = vsel %vm962_vm2, %v1411_v22, %v1418_v35  ;;  %v1282_v16 = vsel %vm415_vm0, %v4575_v44, %v1198_v59 }
 0x234   : > { %v1478_v23 = vrot.slane %v1476_v12, 3  ;;  %v1481_v60 = vrot.slane %v1479_v48, 4  ;;  %v1227_v45 = vpop.permute.xlu1 %1226  ;;  %1917 = vmatmul.mubr.bf16.vlgmr.msra.gmra.mrb[16].mxu0 %v1419_v8  ;;  %v1549_v51 = vsel %vm962_vm2, %v1507_v26, %v1548_v36  ;;  %v1468_v43 = vshrl.u32 %v1282_v16, 16 }
 0x235   : > { %v1540_v34 = vor.u32 %v1539_v1, %v1536_v9  ;;  %v1471_v58 = vshll.u32 %v1282_v16, 16  ;;  %v1299_v11 = vsel %vm415_vm0, %v1060_v24, %v1227_v45  ;;  %1875 = vmatprep.mubr.bf16.mxu1 %v1549_v51  ;;  %v1570_v24 = vshll.u32 %v4608_v57, 16 }
 0x236   : > { %v1482_v32 = vor.u32 %v1481_v60, %v1478_v23  ;;  %v1517_v17 = vshrl.u32 %v1299_v11, 16  ;;  %v1520_v25 = vshll.u32 %v1299_v11, 16  ;;  %v1470_v54 = vrot.slane %v1468_v43, 3  ;;  %v1200_v44 = vpop.permute.xlu0 %1199 }
 0x237   : > { %v1473_v22 = vrot.slane %v1471_v58, 4  ;;  %v1541_v38 = vsel %vm962_vm2, %v4749_v42, %v1540_v34  ;;  %v1285_v10 = vsel %vm415_vm0, %v4646_v63, %v1200_v44  ;;  %v1567_v42 = vshrl.u32 %v4608_v57, 16 }
 0x238   : > { %v1519_v26 = vrot.slane %v1517_v17, 3  ;;  %v1522_v62 = vrot.slane %v1520_v25, 4  ;;  %v1229_v13 = vpop.permute.xlu1 %1228  ;;  %v1483_v49 = vsel %vm962_vm2, %v4752_v40, %v1482_v32  ;;  %v1509_v21 = vshrl.u32 %v1285_v10, 16  ;;  %1876 = vmatmul.mubr.bf16.gmra.mrb[12].mxu1 %v1541_v38 }
 0x239   : > { %v1474_v41 = vor.u32 %v1473_v22, %v1470_v54  ;;  %v1512_v36 = vshll.u32 %v1285_v10, 16  ;;  %v1302_v15 = vsel %vm415_vm0, %v1061_v53, %v1229_v13  ;;  %1924 = vmatprep.mubr.bf16.mxu0 %v1483_v49  ;;  %3541 = vmatprep.mubr.msk.bf16.mxu1 %vm415_vm0, %v4657_v28  ;;  %v1572_v17 = vrot.slane %v1570_v24, 4 }
 0x23a   : > { %v1523_v12 = vor.u32 %v1522_v62, %v1519_v26  ;;  %v1558_v48 = vshrl.u32 %v1302_v15, 16  ;;  %v1561_v9 = vshll.u32 %v1302_v15, 16  ;;  %v1511_v63 = vrot.slane %v1509_v21, 3  ;;  %v1202_v59 = vpop.permute.xlu0 %1201 }
 0x23b   : > { %v1514_v1 = vrot.slane %v1512_v36, 4  ;;  %v1475_v40 = vsel %vm962_vm2, %v1418_v35, %v1474_v41  ;;  %v1288_v60 = vsel %vm415_vm0, %v4637_v7, %v1202_v59  ;;  %v1569_v35 = vrot.slane %v1567_v42, 3 }
 0x23c   : > { %v1560_v8 = vrot.slane %v1558_v48, 3  ;;  %v1563_v23 = vrot.slane %v1561_v9, 4  ;;  %1925 = vmatmul.mubr.bf16.gmra.mrb[20].mxu0 %v1475_v40  ;;  %v1524_v16 = vsel %vm962_vm2, %v1482_v32, %v1523_v12  ;;  %v1550_v51 = vshrl.u32 %v1288_v60, 16 }
 0x23d   : > { %v1515_v45 = vor.u32 %v1514_v1, %v1511_v63  ;;  %v1553_v28 = vshll.u32 %v1288_v60, 16  ;;  %1932 = vmatprep.mubr.bf16.mxu0 %v1524_v16  ;;  %v1573_v25 = vor.u32 %v1572_v17, %v1569_v35  ;;  %v5481_v54 = vmov 0  }
 0x23e   : > { %v1552_v34 = vrot.slane %v1550_v51, 3  ;;  %v1564_v11 = vor.u32 %v1563_v23, %v1560_v8  ;;  %419 = vst.msk [vmem:[#allocation3] sm:$0xff] %vm418_vm10, %v5481_v54  ;;  %420 = vst.msk [vmem:[#allocation3 + $0x28] sm:$0xff] %vm418_vm10, %v5481_v54 }
 0x23f   : > { %v1555_v43 = vrot.slane %v1553_v28, 4  ;;  %v1516_v58 = vsel %vm962_vm2, %v1474_v41, %v1515_v45  ;;  %v1574_v53 = vsel %vm962_vm2, %v4659_v2, %v1573_v25  ;;  %v3310_v25 = vld [vmem:[%s5400_s5] ss:$0 sm:$0xff] }
 0x240   : > { %3542 = vmatmul.mubr.msk.bf16.vlgmr.msra.gmra.mrb[16].mxu1 %vm415_vm0, %v4662_v31  ;;  %v1565_v32 = vsel %vm962_vm2, %v1523_v12, %v1564_v11 }
 0x241   : > { %v1556_v57 = vor.u32 %v1555_v43, %v1552_v34  ;;  %3545 = vmatprep.mubr.msk.bf16.mxu1 %vm415_vm0, %v4666_v3 }
 0x243   : > { %v1557_v7 = vsel %vm962_vm2, %v1515_v45, %v1556_v57 }
 0x244   : > { %1933 = vmatmul.mubr.bf16.gmra.mrb[24].mxu0 %v1516_v58 }
 0x245   : > { %1940 = vmatprep.mubr.bf16.mxu0 %v1565_v32 }
 0x248   : > { %3546 = vmatmul.mubr.msk.bf16.gmra.mrb[20].mxu1 %vm415_vm0, %v1574_v53 }
 0x24c   : > { %1941 = vmatmul.mubr.bf16.gmra.mrb[28].mxu0 %v1557_v7 }
 0x2f2   : > { %v3415_v31 = vpop.f32.mrb[0].mxu1 }
 0x2f3   : > { %v3416_v3 = vpop.f32.mrb[1].mxu1 }
 0x2f4   : > { %v3417_v22 = vadd.f32 %v3416_v3, %v3415_v31  ;;  %v3418_v44 = vpop.f32.mrb[2].mxu1 }
 0x2f5   : > { %v3419_v38 = vpop.f32.mrb[3].mxu1 }
 0x2f6   : > { %v3420_v26 = vadd.f32 %v3419_v38, %v3418_v44 }
 0x2fa   : > { %v3421_v62 = vpop.f32.mrb[4].mxu1 }
 0x2fb   : > { %v3422_v10 = vpop.f32.mrb[5].mxu1 }
 0x2fc   : > { %v3423_v13 = vadd.f32 %v3422_v10, %v3421_v62  ;;  %v3424_v2 = vpop.f32.mrb[6].mxu1 }
 0x2fd   : > { %v3425_v49 = vpop.f32.mrb[7].mxu1 }
 0x2fe   : > { %v3426_v41 = vadd.f32 %v3425_v49, %v3424_v2 }
 0x302   : > { %v3427_v21 = vpop.f32.mrb[8].mxu1 }
 0x303   : > { %v3428_v36 = vpop.f32.mrb[9].mxu1 }
 0x304   : > { %v3429_v15 = vadd.f32 %v3428_v36, %v3427_v21  ;;  %v3430_v12 = vpop.f32.mrb[10].mxu1 }
 0x305   : > { %v3431_v48 = vpop.f32.mrb[11].mxu1 }
 0x306   : > { %v3432_v42 = vadd.f32 %v3431_v48, %v3430_v12 }
 0x307   : > { %v3455_v9 = vpop.f32.mrb[16].mxu0 }
 0x308   : > { %v3456_v63 = vpop.f32.mrb[17].mxu0 }
 0x309   : > { %v3457_v1 = vadd.f32 %v3456_v63, %v3455_v9  ;;  %v3458_v59 = vpop.f32.mrb[18].mxu0 }
 0x30a   : > { %v3459_v40 = vpop.f32.mrb[19].mxu0 }
 0x30b   : > { %v3460_v24 = vadd.f32 %v3459_v40, %v3458_v59  ;;  %v1919_v8 = vadd.f32 %v3457_v1, %v3417_v22  ;;  %v3433_v23 = vpop.f32.mrb[12].mxu1  ;;  %v3311_v22 = vld [vmem:[%s5401_s6] ss:$0 sm:$0xff] }
 0x30c   : > { %v3434_v60 = vpop.f32.mrb[13].mxu1 }
 0x30d   : > { %v1922_v16 = vadd.f32 %v3460_v24, %v3420_v26  ;;  %v3435_v45 = vadd.f32 %v3434_v60, %v3433_v23  ;;  %v3436_v51 = vpop.f32.mrb[14].mxu1 }
 0x30e   : > { %v3437_v28 = vpop.f32.mrb[15].mxu1 }
 0x30f   : > { %v3461_v34 = vpop.f32.mrb[20].mxu0  ;;  %v3438_v43 = vadd.f32 %v3437_v28, %v3436_v51 }
 0x310   : > { %v3462_v58 = vpop.f32.mrb[21].mxu0 }
 0x311   : > { %v3463_v11 = vadd.f32 %v3462_v58, %v3461_v34  ;;  %v3464_v35 = vpop.f32.mrb[22].mxu0 }
 0x312   : > { %v3465_v17 = vpop.f32.mrb[23].mxu0 }
 0x313   : > { %v3466_v57 = vadd.f32 %v3465_v17, %v3464_v35  ;;  %v1927_v7 = vadd.f32 %v3463_v11, %v3423_v13  ;;  %v3543_v32 = vpop.f32.mrb[16].mxu1 }
 0x314   : > { %v1983_v31 = vpop.f32.mrb[17].mxu1 }
 0x315   : > { %v1992_v53 = vadd.f32 %v3543_v32, %v1927_v7  ;;  %v1930_v3 = vadd.f32 %v3466_v57, %v3426_v41  ;;  %v1984_v44 = vadd.f32 %v1983_v31, %v1919_v8  ;;  %v3544_v38 = vpop.f32.mrb[18].mxu1 }
 0x316   : > { %v1986_v10 = vpop.f32.mrb[19].mxu1 }
 0x317   : > { %v2023_v26 = vmul.f32 %v3310_v25, %v1992_v53  ;;  %v1995_v62 = vadd.f32 %v3544_v38, %v1930_v3  ;;  %v3467_v2 = vpop.f32.mrb[24].mxu0  ;;  %v2021_v49 = vmul.f32 %v3310_v25, %v1984_v44  ;;  %v1987_v13 = vadd.f32 %v1986_v10, %v1922_v16 }
 0x318   : > { %v3468_v21 = vpop.f32.mrb[25].mxu0 }
 0x319   : > { %v2038_v36 = vadd.f32 %v3311_v22, %v2023_v26  ;;  %v2024_v12 = vmul.f32 %v3310_v25, %v1995_v62  ;;  %v3469_v48 = vadd.f32 %v3468_v21, %v3467_v2  ;;  %v3470_v9 = vpop.f32.mrb[26].mxu0  ;;  %v2036_v63 = vadd.f32 %v3311_v22, %v2021_v49 }
 0x31a   : > { %v2022_v1 = vmul.f32 %v3310_v25, %v1987_v13  ;;  %v3471_v41 = vpop.f32.mrb[27].mxu0 }
 0x31b   : > { %v2039_v59 = vadd.f32 %v3311_v22, %v2024_v12  ;;  %v3472_v40 = vadd.f32 %v3471_v41, %v3470_v9  ;;  %v1935_v24 = vadd.f32 %v3469_v48, %v3429_v15  ;;  %v3547_v8 = vpop.f32.mrb[20].mxu1  ;;  %v2046_v60 = vmax.f32 %v2038_v36, 0.0 }
 0x31c   : > { %v2037_v23 = vadd.f32 %v3311_v22, %v2022_v1  ;;  %v1999_v28 = vpop.f32.mrb[21].mxu1  ;;  %v2044_v58 = vmax.f32 %v2036_v63, 0.0 }
 0x31d   : > { %v2047_v51 = vmax.f32 %v2039_v59, 0.0  ;;  %v1938_v34 = vadd.f32 %v3472_v40, %v3432_v42  ;;  %v2000_v16 = vadd.f32 %v1999_v28, %v1935_v24  ;;  %v3548_v35 = vpop.f32.mrb[22].mxu1  ;;  %v3700_v28 = vld [vmem:[%s5402_s7 + $0x40] sm:$0xff]  }
 0x31e   : > { %v2045_v11 = vmax.f32 %v2037_v23, 0.0  ;;  %v2002_v17 = vpop.f32.mrb[23].mxu1  ;;  %3487 = vmatprep.subr.bf16.mxu0 %v3700_v28 }
 0x31f   : > { %v3473_v57 = vpop.f32.mrb[28].mxu0  ;;  %v2053_v7 = vpack.c.bf16 %v2047_v51, %v2046_v60  ;;  %v4818_v32 = vpack.i.bf16 %v2047_v51, %v2046_v60  ;;  %v2025_v53 = vmul.f32 %v3310_v25, %v2000_v16  ;;  %v2003_v31 = vadd.f32 %v2002_v17, %v1938_v34  ;;  %v3701_v34 = vld [vmem:[%s5402_s7] sm:$0xff]   ;;  %v3703_v16 = vld [vmem:[%s5402_s7 + $0x8] sm:$0xff]  }
 0x320   : > { %v3474_v3 = vpop.f32.mrb[29].mxu0  ;;  %v2052_v44 = vpack.c.bf16 %v2045_v11, %v2044_v58  ;;  %v4820_v15 = vpack.i.bf16 %v2045_v11, %v2044_v58  ;;  %v2086_v58 = vld [vmem:[#allocation3] sm:$0xf0]  ;;  %3488 = vmatpush3.bf16.msra.mxu0 %v3701_v34  ;;  %v3702_v11 = vld [vmem:[%s5402_s7 + $0x48] sm:$0xff]  }
 0x321   : > { %v3475_v38 = vadd.f32 %v3474_v3, %v3473_v57  ;;  %2062 = vrot.lane.b32.xlu0 %v2053_v7, %s3799_s26  ;;  %v3476_v26 = vpop.f32.mrb[30].mxu0  ;;  %v2040_v42 = vadd.f32 %v3311_v22, %v2025_v53  ;;  %v2026_v62 = vmul.f32 %v3310_v25, %v2003_v31  ;;  %3489 = vmatprep.subr.bf16.mxu0 %v3702_v11  ;;  %v2088_v17 = vsel %vm998_vm7, %v2086_v58, 0  ;;  %v2114_v7 = vld [vmem:[#allocation3 + $0x28] sm:$0x1f] }
 0x322   : > { %2060 = vrot.lane.b32.xlu1 %v2052_v44, %s3799_s26  ;;  %v3477_v10 = vpop.f32.mrb[31].mxu0  ;;  %v2123_v57 = vshll.u32 %v2086_v58, 16 }
 0x323   : > { %v1943_v2 = vadd.f32 %v3475_v38, %v3435_v45  ;;  %v3478_v49 = vadd.f32 %v3477_v10, %v3476_v26  ;;  %v2041_v13 = vadd.f32 %v3311_v22, %v2026_v62  ;;  %v2048_v12 = vmax.f32 %v2040_v42, 0.0  ;;  %v3698_v45 = vld [vmem:[%s5402_s7 + $0x80] sm:$0xff]  }
 0x324   : > { %3549 = vmatprep.subr.bf16.mxu1 %v3698_v45  ;;  %3490 = vmatpush3.bf16.msra.mxu0 %v3703_v16 }
 0x325   : > { %v2008_v21 = vadd.f32 %v3547_v8, %v1943_v2  ;;  %v1946_v36 = vadd.f32 %v3478_v49, %v3438_v43  ;;  %v2049_v48 = vmax.f32 %v2041_v13, 0.0  ;;  %3550 = vmatpush3.bf16.msra.mxu1 %v3698_v45  ;;  %v2093_v2 = vld [vmem:[#allocation3] sm:$0x80]  ;;  %3491 = vmatprep.subr.bf16.mxu0 %v3704_v50 }
 0x327   : > { %v2027_v9 = vmul.f32 %v3310_v25, %v2008_v21  ;;  %v2011_v63 = vadd.f32 %v3548_v35, %v1946_v36  ;;  %v2054_v1 = vpack.c.bf16 %v2049_v48, %v2048_v12  ;;  %v4824_v41 = vpack.i.bf16 %v2049_v48, %v2048_v12  ;;  %v3705_v36 = vld [vmem:[%s5402_s7 + $0x10] sm:$0xff]  }
 0x328   : > { %v2119_v21 = vsel %vm1002_vm14, %v2114_v7, 0  ;;  %3492 = vmatpush3.bf16.msra.mxu0 %v3705_v36 }
 0x329   : > { %v2028_v59 = vmul.f32 %v3310_v25, %v2011_v63  ;;  %v2042_v40 = vadd.f32 %v3311_v22, %v2027_v9  ;;  %2064 = vrot.lane.b32.xlu1 %v2054_v1, %s3799_s26  ;;  %v3699_v25 = vld [vmem:[%s5402_s7 + $0x88] sm:$0xff]   ;;  %v2121_v9 = vshrl.u32 %v2086_v58, 16  ;;  %v2125_v63 = vrot.slane %v2123_v57, 1 }
 0x32a   : > { %3551 = vmatprep.subr.bf16.mxu1 %v3699_v25  ;;  %v4910_v45 = vrot.slane %v2119_v21, 1 }
 0x32b   : > { %v2043_v24 = vadd.f32 %v3311_v22, %v2028_v59  ;;  %v2050_v23 = vmax.f32 %v2042_v40, 0.0  ;;  %3552 = vmatpush3.bf16.msra.mxu1 %v3699_v25  ;;  %v2095_v59 = vsel %vm1022_vm6, %v2093_v2, 0  ;;  %v2126_v28 = vor.u32 %v2125_v63, %v2121_v9  ;;  %v3707_v9 = vld [vmem:[%s5402_s7 + $0x18] sm:$0xff]  }
 0x32c   : > { %v2540_v57 = vshrl.u32 %v4910_v45, 16  ;;  %v2543_v7 = vshll.u32 %v4910_v45, 16  ;;  %vm5484_vm6 = vcmask 1043456  }
 0x32d   : > { %v2051_v60 = vmax.f32 %v2043_v24, 0.0 }
 0x32f   : > { %v2055_v8 = vpack.c.bf16 %v2051_v60, %v2050_v23  ;;  %v4830_v43 = vpack.i.bf16 %v2051_v60, %v2050_v23  ;;  %v2174_v23 = vrot.slane %v2088_v17, 1 }
 0x331   : > { %2066 = vrot.lane.b32.xlu0 %v2055_v8, %s3799_s26 }
 0x393   : > { %v2063_v22 = vpop.permute.xlu0 %2062 }
 0x394   : > { %v2061_v51 = vpop.permute.xlu1 %2060  ;;  %2073 = vst.msk [vmem:[#allocation3 + $0x10] sm:$0xff] %vm418_vm10, %v2063_v22  ;;  %v2198_v22 = vrot.slane %v2095_v59, 4 }
 0x395   : > { %2072 = vst.msk [vmem:[#allocation3 + $0x8] sm:$0xff] %vm418_vm10, %v2061_v51 }
 0x39b   : > { %v4850_v35 = vld [vmem:[#allocation3 + $0x10] sm:$0xff]  ;;  %v2065_v53 = vpop.permute.xlu1 %2064 }
 0x39c   : > { %v2106_v31 = vld [vmem:[#allocation3 + $0x8] sm:$0xf8]  ;;  %v2109_v3 = vsel %vm907_vm15, %v4850_v35, 0  ;;  %v4862_v38 = vsel %vm1046_vm8, %v4850_v35, 0  ;;  %v4867_v26 = vsel %vm1000_vm13, %v4850_v35, 0  ;;  %2074 = vst.msk [vmem:[#allocation3 + $0x18] sm:$0xff] %vm418_vm10, %v2065_v53 }
 0x39d   : > { %v4857_v44 = vld [vmem:[#allocation3 + $0x8] sm:$0xff]  ;;  %v2108_v42 = vsel %vm906_vm4, %v2106_v31, 0  ;;  %2268 = vrot.lane.b32.xlu0 %v2109_v3, %s3800_s15  ;;  %v2243_v61 = vrot.slane %v4862_v38, 5  ;;  %v2177_v48 = vrot.slane %v4867_v26, 1  ;;  %vm5482_vm8 = vcmp.ne.s16.totalorder %v4326_v5, 0  ;;  %v3711_v26 = vld [vmem:[%s5402_s7 + $0x28] sm:$0xff]  }
 0x39e   : > { %v2101_v62 = vsel %vm1045_vm1, %v4857_v44, 0  ;;  %v2089_v10 = vsel %vm999_vm9, %v4857_v44, 0  ;;  %2266 = vrot.lane.b32.xlu1 %v2108_v42, %s3800_s15  ;;  %v4881_v13 = vld [vmem:[#allocation3 + $0x8] sm:$0xf0]  ;;  %v2096_v40 = vsel %vm5482_vm8, %v4857_v44, 0  ;;  %v2128_v24 = vshll.u32 %v4857_v44, 16 }
 0x39f   : > { %v2242_v49 = vrot.slane %v2101_v62, 5  ;;  %v2175_v12 = vrot.slane %v2089_v10, 1  ;;  %vm5483_vm1 = vcmp.ne.s16.totalorder %v4374_v46, 0  ;;  %v2115_v18 = vsel %vm998_vm7, %v4881_v13, 0 }
 0x3a0   : > { %v4905_v60 = vsel %vm5483_vm1, %v4850_v35, 0  ;;  %v2116_v5 = vsel %vm999_vm9, %v4850_v35, 0  ;;  %v2310_v8 = vrot.slane %v2115_v18, 1  ;;  %v2199_v51 = vrot.slane %v2096_v40, 4  ;;  %vm5486_vm9 = vmmov %vm5484_vm6 }
 0x3a1   : > { %v2244_v1 = vsel %vm1183_vm12, %v2242_v49, %v2243_v61  ;;  %v2178_v46 = vsel %vm1123_vm11, %v2175_v12, %v2177_v48  ;;  %v2201_v47 = vrot.slane %v4905_v60, 4  ;;  %v2130_v34 = vrot.slane %v2128_v24, 1  ;;  %v3714_v60 = vld [vmem:[%s5402_s7 + $0x78] sm:$0xff]  }
 0x3a2   : > { %2253 = vrot.lane.b32.xlu0 %v2244_v1, %s3801_s30  ;;  %2251 = vrot.lane.b32.xlu1 %v2242_v49, %s3801_s30  ;;  %v2311_v39 = vrot.slane %v2116_v5, 1  ;;  %v2279_v11 = vshll.u32 %v4881_v13, 16  ;;  %v2176_v16 = vsel %vm1123_vm11, %v2174_v23, %v2175_v12  ;;  %v2132_v53 = vshrl.u32 %v4857_v44, 16  ;;  %v3706_v12 = vld [vmem:[%s5402_s7 + $0x58] sm:$0xff]  }
 0x3a3   : > { %v2067_v25 = vpop.permute.xlu0 %2066  ;;  %v4923_v58 = vld [vmem:[#allocation3 + $0x18] sm:$0xff]  ;;  %v2136_v31 = vshll.u32 %v4850_v35, 16  ;;  %v2200_v62 = vsel %vm5484_vm6, %v2198_v22, %v2199_v51  ;;  %vm5485_vm7 = vcmp.ne.s16.totalorder %v4281_v29, 0  ;;  %v2202_v49 = vsel %vm5486_vm9, %v2199_v51, %v2201_v47  ;;  %3493 = vmatprep.subr.bf16.mxu0 %v3706_v12 }
 0x3a4   : > { %2075 = vst.msk [vmem:[#allocation3 + $0x20] sm:$0xff] %vm418_vm10, %v2067_v25  ;;  %v2117_v17 = vsel %vm1000_vm13, %v4923_v58, 0  ;;  %v2312_v3 = vsel %vm1123_vm11, %v2310_v8, %v2311_v39  ;;  %v4941_v19 = vsel %vm5485_vm7, %v4923_v58, 0  ;;  %v2134_v21 = vor.u32 %v2132_v53, %v2130_v34  ;;  %v3708_v8 = vld [vmem:[%s5402_s7 + $0x60] sm:$0xff]   ;;  %3494 = vmatpush3.bf16.msra.mxu0 %v3707_v9  ;;  %vm5490_vm6 = vmmov %vm5485_vm7 }
 0x3a5   : > { %v2313_v42 = vrot.slane %v2117_v17, 1  ;;  %v2457_v10 = vshrl.u32 %v2312_v3, 16  ;;  %v2460_v2 = vshll.u32 %v2312_v3, 16  ;;  %v2281_v36 = vrot.slane %v2279_v11, 1  ;;  %v3709_v11 = vld [vmem:[%s5402_s7 + $0x20] sm:$0xff]   ;;  %3495 = vmatprep.subr.bf16.mxu0 %v3708_v8 }
 0x3a6   : > { %2185 = vrot.lane.b32.xlu0 %v2178_v46, %s3800_s15  ;;  %2183 = vrot.lane.b32.xlu1 %v2176_v16, %s3800_s15  ;;  %v2138_v23 = vrot.slane %v2136_v31, 1  ;;  %v2179_v18 = vrot.slane %v4941_v19, 1  ;;  %v4958_v5 = vrot.slane %v2540_v57, 3  ;;  %v2277_v22 = vshrl.u32 %v4881_v13, 16 }
 0x3a7   : > { %v2314_v50 = vsel %vm1123_vm11, %v2311_v39, %v2313_v42  ;;  %v2459_v63 = vrot.slane %v2457_v10, 3  ;;  %v2462_v1 = vrot.slane %v2460_v2, 4  ;;  %vm5487_vm13 = vcmp.ne.s16.totalorder %v4437_v4, 0  ;;  %v3710_v4 = vld [vmem:[%s5402_s7 + $0x68] sm:$0xff]  }
 0x3a8   : > { %v2465_v59 = vshrl.u32 %v2314_v50, 16  ;;  %v2468_v40 = vshll.u32 %v2314_v50, 16  ;;  %v4967_v51 = vsel %vm5487_vm13, %v4923_v58, 0  ;;  %vm5488_vm8 = vsmask.f32 7424  ;;  %3496 = vmatpush3.bf16.msra.mxu0 %v3709_v11 }
 0x3a9   : > { %v2131_v16 = vsel %vm5488_vm8, %v2126_v28, %v2130_v34  ;;  %vm5489_vm1 = vmmov %vm5488_vm8  ;;  %v4979_v57 = vrot.slane %v2543_v7, 4  ;;  %v2463_v3 = vor.u32 %v2462_v1, %v2459_v63  ;;  %v2282_v10 = vor.u32 %v2281_v36, %v2277_v22  ;;  %3497 = vmatprep.subr.bf16.mxu0 %v3710_v4 }
 0x3aa   : > { %2209 = vrot.lane.b32.xlu0 %v2202_v49, %s3799_s26  ;;  %2207 = vrot.lane.b32.xlu1 %v2200_v62, %s3799_s26  ;;  %v2467_v25 = vrot.slane %v2465_v59, 3  ;;  %v2470_v46 = vrot.slane %v2468_v40, 4  ;;  %v2139_v17 = vsel %vm5489_vm1, %v2134_v21, %v2138_v23  ;;  %v2221_v28 = vrot.slane %v2136_v31, 5  ;;  %vm5491_vm7 = vmmov %vm5489_vm1  ;;  %v3712_v59 = vld [vmem:[%s5402_s7 + $0x70] sm:$0xff]  }
 0x3ab   : > { %v4969_v39 = vld [vmem:[#allocation3 + $0x20] sm:$0xff]  ;;  %v2180_v29 = vsel %vm1123_vm11, %v2177_v48, %v2179_v18  ;;  %v2203_v34 = vrot.slane %v4967_v51, 4  ;;  %v2140_v7 = vshrl.u32 %v4850_v35, 16  ;;  %v2144_v36 = vshll.u32 %v4923_v58, 16 }
 0x3ac   : > { %v2118_v13 = vsel %vm5490_vm6, %v4969_v39, 0  ;;  %v2471_v62 = vor.u32 %v2470_v46, %v2467_v25  ;;  %v2283_v63 = vsel %vm5491_vm7, %v2282_v10, %v2138_v23  ;;  %v2217_v1 = vrot.slane %v2132_v53, 4  ;;  %v2087_v22 = vld [vmem:[#allocation3 + $0x20] sm:$0x1f]  ;;  %3498 = vmatpush3.bf16.msra.mxu0 %v3711_v26 }
 0x3ad   : > { %v2315_v2 = vrot.slane %v2118_v13, 1  ;;  %v2146_v11 = vrot.slane %v2144_v36, 1  ;;  %v2232_v53 = vshll.u32 %v4969_v39, 16  ;;  %v2225_v10 = vrot.slane %v2144_v36, 5  ;;  %3499 = vmatprep.subr.bf16.mxu0 %v3712_v59 }
 0x3ae   : > { %2161 = vrot.lane.b32.xlu0 %v2139_v17, %s3801_s30  ;;  %2159 = vrot.lane.b32.xlu1 %v2131_v16, %s3801_s30  ;;  %v2472_v49 = vsel %vm962_vm2, %v2463_v3, %v2471_v62  ;;  %v2229_v16 = vshrl.u32 %v4969_v39, 16  ;;  %v3713_v17 = vld [vmem:[%s5402_s7 + $0x30] sm:$0xff]   ;;  %v2220_v3 = vrot.slane %v2140_v7, 4  ;;  %vm5492_vm13 = vcmp.ne.s16.totalorder %v4571_v6, 0 }
 0x3af   : > { %v2316_v21 = vsel %vm1123_vm11, %v2313_v42, %v2315_v2  ;;  %v2318_v50 = vsel %vm1123_vm11, %v2315_v2, %v4910_v45  ;;  %3553 = vmatprep.mubr.msk.bf16.mxu1 %vm418_vm10, %v2472_v49  ;;  %v2142_v42 = vor.u32 %v2140_v7, %v2138_v23  ;;  %v2148_v45 = vshrl.u32 %v4923_v58, 16 }
 0x3b0   : > { %v2490_v48 = vshrl.u32 %v2316_v21, 16  ;;  %v2493_v31 = vshll.u32 %v2316_v21, 16  ;;  %v2515_v12 = vshrl.u32 %v2318_v50, 16  ;;  %v2518_v9 = vshll.u32 %v2318_v50, 16  ;;  %3500 = vmatpush3.bf16.msra.mxu0 %v3713_v17  ;;  %v2100_v17 = vld [vmem:[#allocation3 + $0x28] sm:$0x1] }
 0x3b1   : > { %v2204_v23 = vsel %vm5486_vm9, %v2201_v47, %v2203_v34  ;;  %v2111_v47 = vsel %vm909_vm5, %v4969_v39, 0  ;;  %v2103_v2 = vsel %vm5492_vm13, %v4923_v58, 0  ;;  %v2224_v7 = vrot.slane %v2148_v45, 4  ;;  %3501 = vmatprep.subr.bf16.mxu0 %v3714_v60 }
 0x3b2   : > { %2187 = vrot.lane.b32.xlu0 %v2180_v29, %s3800_s15  ;;  %2295 = vrot.lane.b32.xlu1 %v2283_v63, %s3799_s26  ;;  %v2492_v40 = vrot.slane %v2490_v48, 3  ;;  %v2495_v8 = vrot.slane %v2493_v31, 4  ;;  %v2517_v25 = vrot.slane %v2515_v12, 3  ;;  %v2520_v46 = vrot.slane %v2518_v9, 4 }
 0x3b3   : > { %v5033_v29 = vsel %vm1002_vm14, %v2087_v22, 0  ;;  %v2234_v50 = vrot.slane %v2232_v53, 5  ;;  %v2231_v36 = vrot.slane %v2229_v16, 4  ;;  %vm5493_vm14 = vmmov %vm5489_vm1  ;;  %v2222_v48 = vor.u32 %v2221_v28, %v2220_v3 }
 0x3b4   : > { %v2496_v13 = vor.u32 %v2495_v8, %v2492_v40  ;;  %v2521_v4 = vor.u32 %v2520_v46, %v2517_v25  ;;  %v2147_v6 = vsel %vm5493_vm14, %v2142_v42, %v2146_v11  ;;  %v2181_v26 = vrot.slane %v5033_v29, 1  ;;  %3502 = vmatpush3.bf16.msra.mxu0 %v3715_v20  ;;  %v2107_v25 = vld [vmem:[#allocation3 + $0x28] sm:$0xf]  ;;  %vm5499_vm13 = vmmov %vm5493_vm14 }
 0x3b5   : > { %v2110_v31 = vsel %vm908_vm3, %v4923_v58, 0  ;;  %v2245_v12 = vrot.slane %v2103_v2, 5  ;;  %v2546_v9 = vor.u32 %v4979_v57, %v4958_v5  ;;  %vm5494_vm8 = vcmp.ne.s16.totalorder %v4635_v33, 0 }
 0x3b6   : > { %2211 = vrot.lane.b32.xlu0 %v2204_v23, %s3799_s26  ;;  %2272 = vrot.lane.b32.xlu1 %v2111_v47, %s3800_s15  ;;  %v2497_v49 = vsel %vm962_vm2, %v2471_v62, %v2496_v13  ;;  %v2522_v21 = vsel %vm962_vm2, %v2496_v13, %v2521_v4  ;;  %v2218_v62 = vrot.slane %v2128_v24, 5  ;;  %v2104_v63 = vsel %vm5494_vm8, %v4969_v39, 0  ;;  %vm5501_vm8 = vmmov %vm5499_vm13 }
 0x3b7   : > { %3554 = vmatmul.mubr.msk.bf16.vlgmr.msra.gmra.mrb[24].mxu1 %vm418_vm10, %v2497_v49  ;;  %v2226_v24 = vor.u32 %v2225_v10, %v2224_v7  ;;  %v5063_v28 = vor.u32 %v2234_v50, %v2231_v36  ;;  %v2182_v59 = vsel %vm1123_vm11, %v2179_v18, %v2181_v26  ;;  %vm5495_vm1 = vsmask.f32 3328 }
 0x3b8   : > { %3557 = vmatprep.mubr.msk.bf16.mxu1 %vm418_vm10, %v2522_v21  ;;  %v5061_v42 = vor.u32 %v2218_v62, %v2217_v1  ;;  %vm5496_vm6 = vmmov %vm5495_vm1  ;;  %v2246_v57 = vsel %vm1183_vm12, %v2243_v61, %v2245_v12  ;;  %v2247_v19 = vrot.slane %v2104_v63, 5  ;;  %vm5498_vm11 = vcmp.ne.s16.totalorder %v4513_v27, 0  ;;  %v5086_v1 = vld [vmem:[#allocation3 + $0x20] sm:$0xf] }
 0x3b9   : > { %v5073_v5 = vsel %vm5496_vm6, %v2222_v48, %v2226_v24  ;;  %vm5497_vm7 = vmmov %vm5495_vm1  ;;  %v2099_v18 = vsel %vm5498_vm11, %v4969_v39, 0  ;;  %v2547_v8 = vsel %vm962_vm2, %v2521_v4, %v2546_v9  ;;  %v2152_v38 = vshll.u32 %v5086_v1, 16 }
 0x3ba   : > { %2297 = vrot.lane.b32.xlu0 %v2147_v6, %s3799_s26  ;;  %2270 = vrot.lane.b32.xlu1 %v2110_v31, %s3800_s15  ;;  %v5070_v40 = vsel %vm5495_vm1, %v5061_v42, %v2222_v48  ;;  %v5077_v33 = vsel %vm5497_vm7, %v2226_v24, %v5063_v28  ;;  %v2205_v46 = vrot.slane %v2099_v18, 4  ;;  %v2248_v61 = vsel %vm1183_vm12, %v2245_v12, %v2247_v19  ;;  %vm5502_vm1 = vmmov %vm5501_vm8 }
 0x3bb   : > { %v2284_v27 = vrot.slane %v2232_v53, 1  ;;  %v2288_v22 = vshll.u32 %v2107_v25, 16  ;;  %v2150_v23 = vor.u32 %v2148_v45, %v2146_v11  ;;  %v2154_v4 = vrot.slane %v2152_v38, 1 }
 0x3bc   : > { %v2206_v13 = vsel %vm5486_vm9, %v2203_v34, %v2205_v46  ;;  %vm5500_vm14 = vcmp.ne.s16.totalorder %v4556_v37, 0  ;;  %v2156_v11 = vshrl.u32 %v5086_v1, 16  ;;  %v2292_v37 = vshrl.u32 %v2107_v25, 16 }
 0x3bd   : > { %v2285_v3 = vsel %vm5499_vm13, %v2150_v23, %v2284_v27  ;;  %v2286_v10 = vor.u32 %v2284_v27, %v2229_v16  ;;  %v2290_v53 = vrot.slane %v2288_v22, 1  ;;  %v2105_v60 = vsel %vm5500_vm14, %v2100_v17, 0 }
 0x3be   : > { %2189 = vrot.lane.b32.xlu0 %v2182_v59, %s3800_s15  ;;  %2255 = vrot.lane.b32.xlu1 %v2246_v57, %s3801_s30  ;;  %v2155_v45 = vsel %vm5501_vm8, %v2150_v23, %v2154_v4  ;;  %v2249_v34 = vrot.slane %v2105_v60, 5  ;;  %v2158_v47 = vor.u32 %v2156_v11, %v2154_v4  ;;  %vm5503_vm6 = vcmp.ne.s16.totalorder %v4287_v52, 0 }
 0x3bf   : > { %3558 = vmatmul.mubr.msk.bf16.gmra.mrb[28].mxu1 %vm418_vm10, %v2547_v8  ;;  %v2291_v51 = vsel %vm5502_vm1, %v2286_v10, %v2290_v53  ;;  %v2112_v16 = vsel %vm5503_vm6, %v2107_v25, 0  ;;  %v2294_v2 = vor.u32 %v2292_v37, %v2290_v53 }
 0x3c0   : > { %3056 = vmatprep.mubr.bf16.mxu1 %v5481_v54  ;;  %v2250_v39 = vsel %vm1183_vm12, %v2247_v19, %v2249_v34  ;;  %vm2344_vm12 = vcmask 785408  }
 0x3c2   : > { %2163 = vrot.lane.b32.xlu0 %v2147_v6, %s3801_s30  ;;  %2257 = vrot.lane.b32.xlu1 %v2248_v61, %s3801_s30  ;;  %v2076_v6 = vld [vmem:[#allocation3] sm:$0xf8] }
 0x3c6   : > { %2213 = vrot.lane.b32.xlu0 %v2206_v13, %s3799_s26  ;;  %2299 = vrot.lane.b32.xlu1 %v2285_v3, %s3799_s26 }
 0x3ca   : > { %2165 = vrot.lane.b32.xlu0 %v2155_v45, %s3801_s30  ;;  %2301 = vrot.lane.b32.xlu1 %v2291_v51, %s3799_s26 }
 0x3ce   : > { %2167 = vrot.lane.b32.xlu0 %v2158_v47, %s3801_s30  ;;  %2259 = vrot.lane.b32.xlu1 %v2250_v39, %s3801_s30 }
 0x3d2   : > { %2191 = vrot.lane.b32.xlu0 %v2181_v26, %s3800_s15  ;;  %2274 = vrot.lane.b32.xlu1 %v2112_v16, %s3800_s15 }
 0x3d6   : > { %2215 = vrot.lane.b32.xlu0 %v2205_v46, %s3799_s26  ;;  %2303 = vrot.lane.b32.xlu1 %v2294_v2, %s3799_s26  ;;  %s3241_s26 = sshll.u32 %s404_s16, 7 }
 0x3da   : > { %3607 = vrot.lane.b32.xlu1 %v4820_v15, %s3801_s30  ;;  %v2081_v15 = vsel %vm906_vm4, %v2076_v6, 0  ;;  %vm5504_vm4 = vmmov %vm5503_vm6 }
 0x3de   : > { %3617 = vrot.lane.b32.xlu1 %v4818_v32, %s3801_s30  ;;  %v2082_v32 = vsel %vm907_vm15, %v4857_v44, 0 }
 0x3e2   : > { %3627 = vrot.lane.b32.xlu1 %v4824_v41, %s3801_s30 }
 0x3e6   : > { %3637 = vrot.lane.b32.xlu1 %v4830_v43, %s3801_s30  ;;  %s5301_s30 = scalar_lea.vmem [#allocation4], %s3241_s26 }
 0x3e7   : > { %s3175_s20 = sshll.u32 %s5301_s30, 4  ;;  %s5347_s20 = int_to_ptr.vmem [resolvable:$true] %s3175_s20 }
 0x40f   : > { %v2269_v29 = vpop.permute.xlu0 %2268 }
 0x410   : > { %v2267_v7 = vpop.permute.xlu1 %2266 }
 0x414   : > { %v2254_v49 = vpop.permute.xlu0 %2253  ;;  %v2252_v21 = vpop.permute.xlu1 %2251 }
 0x415   : > { %v2357_v12 = vsel %vm418_vm10, %v5061_v42, %v2252_v21  ;;  %v2360_v18 = vsel %vm418_vm10, %v5070_v40, %v2254_v49 }
 0x416   : > { %v2371_v44 = vsel %vm415_vm0, %v2357_v12, %v2267_v7  ;;  %v2373_v22 = vsel %vm415_vm0, %v2360_v18, %v2269_v29  ;;  %v2083_v29 = vsel %vm908_vm3, %v4850_v35, 0 }
 0x418   : > { %v2186_v50 = vpop.permute.xlu0 %2185  ;;  %v2184_v36 = vpop.permute.xlu1 %2183 }
 0x41c   : > { %v2210_v20 = vpop.permute.xlu0 %2209  ;;  %v2208_v26 = vpop.permute.xlu1 %2207 }
 0x420   : > { %v2162_v41 = vpop.permute.xlu0 %2161  ;;  %v2160_v62 = vpop.permute.xlu1 %2159 }
 0x421   : > { %v2324_v43 = vsel %vm418_vm10, %v2082_v32, %v2162_v41  ;;  %v2321_v48 = vsel %vm418_vm10, %v2081_v15, %v2160_v62 }
 0x422   : > { %v2337_v31 = vsel %vm415_vm0, %v2324_v43, %v2186_v50  ;;  %v2335_v9 = vsel %vm415_vm0, %v2321_v48, %v2184_v36 }
 0x423   : > { %v2348_v63 = vsel %vm2344_vm12, %v2337_v31, %v2210_v20  ;;  %v2346_v30 = vsel %vm2344_vm12, %v2335_v9, %v2208_v26  ;;  %v2084_v9 = vsel %vm909_vm5, %v4923_v58, 0 }
 0x424   : > { %v2188_v14 = vpop.permute.xlu0 %2187  ;;  %v2296_v24 = vpop.permute.xlu1 %2295  ;;  %v2433_v57 = vshrl.u32 %v2348_v63, 16  ;;  %v2426_v8 = vshrl.u32 %v2346_v30, 16  ;;  %v2429_v25 = vshll.u32 %v2346_v30, 16  ;;  %v2436_v42 = vshll.u32 %v2348_v63, 16 }
 0x425   : > { %v2381_v59 = vsel %vm2344_vm12, %v2371_v44, %v2296_v24 }
 0x426   : > { %v2441_v38 = vshrl.u32 %v2381_v59, 16  ;;  %v2444_v61 = vshll.u32 %v2381_v59, 16  ;;  %v2435_v27 = vrot.slane %v2433_v57, 3  ;;  %v2428_v17 = vrot.slane %v2426_v8, 3 }
 0x427   : > { %v2431_v13 = vrot.slane %v2429_v25, 4  ;;  %v2438_v4 = vrot.slane %v2436_v42, 4 }
 0x428   : > { %v2212_v19 = vpop.permute.xlu0 %2211  ;;  %v2273_v46 = vpop.permute.xlu1 %2272  ;;  %v2443_v53 = vrot.slane %v2441_v38, 3  ;;  %v2446_v60 = vrot.slane %v2444_v61, 4 }
 0x429   : > { %v2432_v47 = vor.u32 %v2431_v13, %v2428_v17  ;;  %v2439_v39 = vor.u32 %v2438_v4, %v2435_v27 }
 0x42a   : > { %v2447_v16 = vor.u32 %v2446_v60, %v2443_v53 }
 0x42b   : > { %v2440_v36 = vsel %vm962_vm2, %v2432_v47, %v2439_v39 }
 0x42c   : > { %v2298_v23 = vpop.permute.xlu0 %2297  ;;  %v2271_v3 = vpop.permute.xlu1 %2270 }
 0x42d   : > { %v2383_v10 = vsel %vm2344_vm12, %v2373_v22, %v2298_v23 }
 0x42e   : > { %v2448_v45 = vshrl.u32 %v2383_v10, 16  ;;  %v2451_v40 = vshll.u32 %v2383_v10, 16 }
 0x430   : > { %v2450_v51 = vrot.slane %v2448_v45, 3  ;;  %v2453_v34 = vrot.slane %v2451_v40, 4  ;;  %v2190_v11 = vpop.permute.xlu0 %2189  ;;  %v2256_v37 = vpop.permute.xlu1 %2255  ;;  %v2085_v45 = vsel %vm5504_vm4, %v5086_v1, 0 }
 0x431   : > { %v2363_v20 = vsel %vm418_vm10, %v5073_v5, %v2256_v37 }
 0x432   : > { %v2454_v2 = vor.u32 %v2453_v34, %v2450_v51  ;;  %v2375_v32 = vsel %vm415_vm0, %v2363_v20, %v2271_v3 }
 0x434   : > { %v2164_v7 = vpop.permute.xlu0 %2163  ;;  %v2455_v49 = vsel %vm962_vm2, %v2447_v16, %v2454_v2  ;;  %v2258_v21 = vpop.permute.xlu1 %2257 }
 0x435   : > { %v2327_v50 = vsel %vm418_vm10, %v2083_v29, %v2164_v7  ;;  %2708 = vmatprep.mubr.bf16.mxu0 %v2455_v49  ;;  %v2366_v62 = vsel %vm418_vm10, %v5077_v33, %v2258_v21 }
 0x436   : > { %v2339_v6 = vsel %vm415_vm0, %v2327_v50, %v2188_v14  ;;  %2709 = vmatmul.mubr.bf16.vlgmr.msra.gmra.mrb[32].mxu0 %v2440_v36  ;;  %v2377_v44 = vsel %vm415_vm0, %v2366_v62, %v2273_v46 }
 0x437   : > { %v2350_v26 = vsel %vm2344_vm12, %v2339_v6, %v2212_v19 }
 0x438   : > { %v2473_v15 = vshrl.u32 %v2350_v26, 16  ;;  %v2476_v55 = vshll.u32 %v2350_v26, 16  ;;  %v2214_v35 = vpop.permute.xlu0 %2213  ;;  %v2300_v41 = vpop.permute.xlu1 %2299 }
 0x439   : > { %v2385_v31 = vsel %vm2344_vm12, %v2375_v32, %v2300_v41 }
 0x43a   : > { %v2475_v43 = vrot.slane %v2473_v15, 3  ;;  %v2478_v48 = vrot.slane %v2476_v55, 4  ;;  %v2481_v12 = vshrl.u32 %v2385_v31, 16  ;;  %v2484_v5 = vshll.u32 %v2385_v31, 16  ;;  %v3716_v31 = vld [vmem:[%s5405_s10] ss:$8 sps:$4 sm:$0xff]  }
 0x43c   : > { %v2166_v14 = vpop.permute.xlu0 %2165  ;;  %v2479_v63 = vor.u32 %v2478_v48, %v2475_v43  ;;  %v2483_v24 = vrot.slane %v2481_v12, 3  ;;  %v2486_v30 = vrot.slane %v2484_v5, 4  ;;  %v2302_v59 = vpop.permute.xlu1 %2301  ;;  %v3718_v12 = vld [vmem:[%s5405_s10 + $0x4] ss:$8 sps:$4 sm:$0xff]   ;;  %v3721_v5 = vld [vmem:[%s5405_s10 + $0x14] ss:$8 sps:$4 sm:$0xff]  }
 0x43d   : > { %v2330_v57 = vsel %vm418_vm10, %v2084_v9, %v2166_v14  ;;  %v2387_v33 = vsel %vm2344_vm12, %v2377_v44, %v2302_v59  ;;  %3024 = vmatprep.subr.bf16.mxu1 %v3718_v12  ;;  %v3719_v9 = vld [vmem:[%s5405_s10 + $0x10] ss:$8 sps:$4 sm:$0xff]   ;;  %v3724_v14 = vld [vmem:[%s5405_s10 + $0x24] ss:$8 sps:$4 sm:$0xff]   ;;  %v3728_v59 = vld [vmem:[%s5405_s10 + $0x40] ss:$8 sps:$4 sm:$0xff]  }
 0x43e   : > { %v2341_v19 = vsel %vm415_vm0, %v2330_v57, %v2190_v11  ;;  %v2480_v18 = vsel %vm962_vm2, %v2439_v39, %v2479_v63  ;;  %v2487_v8 = vor.u32 %v2486_v30, %v2483_v24  ;;  %v2506_v25 = vshrl.u32 %v2387_v33, 16  ;;  %3025 = vmatpush1.bf16.msra.mxu1 %v3716_v31  ;;  %v3727_v24 = vld [vmem:[%s5405_s10 + $0x34] ss:$8 sps:$4 sm:$0xff]   ;;  %v3725_v30 = vld [vmem:[%s5405_s10 + $0x30] ss:$8 sps:$4 sm:$0xff]  }
 0x43f   : > { %v2509_v42 = vshll.u32 %v2387_v33, 16  ;;  %v2352_v56 = vsel %vm2344_vm12, %v2341_v19, %v2214_v35  ;;  %3026 = vmatprep.subr.bf16.mxu1 %v3721_v5  ;;  %v3730_v44 = vld [vmem:[%s5405_s10 + $0x44] ss:$8 sps:$4 sm:$0xff]  }
 0x440   : > { %v2498_v58 = vshrl.u32 %v2352_v56, 16  ;;  %v2501_v38 = vshll.u32 %v2352_v56, 16  ;;  %v2168_v61 = vpop.permute.xlu0 %2167  ;;  %v2508_v27 = vrot.slane %v2506_v25, 3  ;;  %v2260_v46 = vpop.permute.xlu1 %2259  ;;  %v2488_v23 = vsel %vm962_vm2, %v2454_v2, %v2487_v8 }
 0x441   : > { %v2511_v22 = vrot.slane %v2509_v42, 4  ;;  %2716 = vmatprep.mubr.bf16.mxu0 %v2488_v23  ;;  %v2333_v51 = vsel %vm418_vm10, %v2085_v45, %v2168_v61  ;;  %v2369_v34 = vsel %vm418_vm10, %v5063_v28, %v2260_v46 }
 0x442   : > { %v2500_v17 = vrot.slane %v2498_v58, 3  ;;  %v2503_v13 = vrot.slane %v2501_v38, 4  ;;  %2717 = vmatmul.mubr.bf16.gmra.mrb[36].mxu0 %v2480_v18  ;;  %3027 = vmatpush1.bf16.msra.mxu1 %v3719_v9  ;;  %v3335_v58 = vld [vmem:[%s5404_s9] ss:$0 sm:$0xff] }
 0x443   : > { %v2512_v4 = vor.u32 %v2511_v22, %v2508_v27  ;;  %3028 = vmatprep.subr.bf16.mxu1 %v3724_v14  ;;  %v3731_v27 = vld [vmem:[%s5405_s10 + $0x50] ss:$8 sps:$4 sm:$0xff]   ;;  %v3733_v22 = vld [vmem:[%s5405_s10 + $0x54] ss:$8 sps:$4 sm:$0xff]  }
 0x444   : > { %v2192_v3 = vpop.permute.xlu0 %2191  ;;  %v2504_v10 = vor.u32 %v2503_v13, %v2500_v17  ;;  %v2275_v53 = vpop.permute.xlu1 %2274 }
 0x445   : > { %v2513_v60 = vsel %vm962_vm2, %v2487_v8, %v2512_v4  ;;  %v2343_v11 = vsel %vm415_vm0, %v2333_v51, %v2192_v3  ;;  %v2379_v39 = vsel %vm415_vm0, %v2369_v34, %v2275_v53  ;;  %v3334_v8 = vld [vmem:[%s5403_s8] ss:$0 sm:$0xff] }
 0x446   : > { %2724 = vmatprep.mubr.bf16.mxu0 %v2513_v60  ;;  %v2505_v40 = vsel %vm962_vm2, %v2479_v63, %v2504_v10  ;;  %v3722_v63 = vld [vmem:[%s5405_s10 + $0x20] ss:$8 sps:$4 sm:$0xff]  }
 0x447   : > { %3029 = vmatpush1.bf16.msra.mxu1 %v3722_v63 }
 0x448   : > { %v2216_v47 = vpop.permute.xlu0 %2215  ;;  %v2304_v37 = vpop.permute.xlu1 %2303  ;;  %3030 = vmatprep.subr.bf16.mxu1 %v3727_v24 }
 0x449   : > { %v2354_v16 = vsel %vm2344_vm12, %v2343_v11, %v2216_v47  ;;  %v2389_v2 = vsel %vm2344_vm12, %v2379_v39, %v2304_v37 }
 0x44a   : > { %v2523_v52 = vshrl.u32 %v2354_v16, 16  ;;  %v2526_v1 = vshll.u32 %v2354_v16, 16  ;;  %v2531_v29 = vshrl.u32 %v2389_v2, 16  ;;  %v2534_v7 = vshll.u32 %v2389_v2, 16  ;;  %2725 = vmatmul.mubr.bf16.gmra.mrb[40].mxu0 %v2505_v40 }
 0x44b   : > { %3031 = vmatpush1.bf16.msra.mxu1 %v3725_v30 }
 0x44c   : > { %v2525_v49 = vrot.slane %v2523_v52, 3  ;;  %v2528_v21 = vrot.slane %v2526_v1, 4  ;;  %v2533_v50 = vrot.slane %v2531_v29, 3  ;;  %v2536_v36 = vrot.slane %v2534_v7, 4  ;;  %3032 = vmatprep.subr.bf16.mxu1 %v3730_v44 }
 0x44e   : > { %v2529_v28 = vor.u32 %v2528_v21, %v2525_v49  ;;  %v2537_v20 = vor.u32 %v2536_v36, %v2533_v50 }
 0x44f   : > { %3033 = vmatpush1.bf16.msra.mxu1 %v3728_v59 }
 0x450   : > { %v2530_v6 = vsel %vm962_vm2, %v2504_v10, %v2529_v28  ;;  %v2538_v26 = vsel %vm962_vm2, %v2512_v4, %v2537_v20  ;;  %3034 = vmatprep.subr.bf16.mxu1 %v3733_v22 }
 0x451   : > { %2732 = vmatprep.mubr.bf16.mxu0 %v2538_v26 }
 0x452   : > { %2733 = vmatmul.mubr.bf16.gmra.mrb[44].mxu0 %v2530_v6 }
 0x453   : > { %3035 = vmatpush1.bf16.msra.mxu1 %v3731_v27  ;;  %v5505_v27 = vmax.f32 %v4019_v0, 0.0 }
 0x48a   : > { %v3555_v15 = vpop.f32.mrb[24].mxu1 }
 0x48b   : > { %v2775_v55 = vpop.f32.mrb[25].mxu1 }
 0x48c   : > { %v3556_v35 = vpop.f32.mrb[26].mxu1 }
 0x48d   : > { %v2778_v32 = vpop.f32.mrb[27].mxu1 }
 0x492   : > { %v5187_v41 = vpop.f32.mrb[28].mxu1 }
 0x493   : > { %v2791_v62 = vpop.f32.mrb[29].mxu1 }
 0x494   : > { %v5189_v43 = vpop.f32.mrb[30].mxu1 }
 0x495   : > { %v5191_v48 = vpop.f32.mrb[31].mxu1 }
 0x509   : > { %v3503_v57 = vpop.f32.mrb[32].mxu0 }
 0x50a   : > { %v3504_v33 = vpop.f32.mrb[33].mxu0 }
 0x50b   : > { %v3505_v19 = vadd.f32 %v3504_v33, %v3503_v57  ;;  %v3506_v18 = vpop.f32.mrb[34].mxu0 }
 0x50c   : > { %v3507_v25 = vpop.f32.mrb[35].mxu0 }
 0x50d   : > { %v2776_v42 = vadd.f32 %v3505_v19, %v2775_v55  ;;  %v3508_v56 = vadd.f32 %v3507_v25, %v3506_v18  ;;  %v3608_v25 = vpop.permute.xlu1 %3607 }
 0x50f   : > { %v2813_v38 = vmul.f32 %v3334_v8, %v2776_v42  ;;  %v2779_v61 = vadd.f32 %v3508_v56, %v2778_v32  ;;  %v3610_v42 = vunpack.i.h.bf16 %v3608_v25 }
 0x511   : > { %v2814_v46 = vmul.f32 %v3334_v8, %v2779_v61  ;;  %v2828_v23 = vadd.f32 %v3335_v58, %v2813_v38 }
 0x513   : > { %v2829_v17 = vadd.f32 %v3335_v58, %v2814_v46  ;;  %v2836_v13 = vmax.f32 %v2828_v23, 0.0 }
 0x515   : > { %v2837_v4 = vmax.f32 %v2829_v17, 0.0  ;;  %v3509_v3 = vpop.f32.mrb[36].mxu0 }
 0x516   : > { %v3510_v10 = vpop.f32.mrb[37].mxu0 }
 0x517   : > { %v3611_v53 = vpack.i.bf16 %v2837_v4, %v2836_v13  ;;  %v3511_v60 = vadd.f32 %v3510_v10, %v3509_v3  ;;  %v3512_v45 = vpop.f32.mrb[38].mxu0  ;;  %v3618_v13 = vpop.permute.xlu1 %3617 }
 0x518   : > { %v3513_v40 = vpop.f32.mrb[39].mxu0  ;;  %v3620_v4 = vunpack.i.h.bf16 %v3618_v13  ;;  %v3619_v3 = vunpack.i.l.bf16 %v3618_v13 }
 0x519   : > { %3612 = vrot.lane.b32.xlu0 %v3611_v53, %s3800_s15  ;;  %v2784_v51 = vadd.f32 %v3555_v15, %v3511_v60  ;;  %v3514_v34 = vadd.f32 %v3513_v40, %v3512_v45  ;;  %v5508_v60 = vld [vmem:[#allocation13_spill] sm:$0xff] }
 0x51a   : > { %v5509_v45 = vmax.f32 %v5508_v60, 0.0 }
 0x51b   : > { %v2815_v11 = vmul.f32 %v3334_v8, %v2784_v51  ;;  %v2787_v47 = vadd.f32 %v3556_v35, %v3514_v34  ;;  %v5510_v51 = vld [vmem:[#allocation12_spill] sm:$0xff] }
 0x51c   : > { %v2911_v40 = vsel %vm418_vm10, %v5509_v45, %v3620_v4  ;;  %v5511_v34 = vmax.f32 %v5510_v51, 0.0 }
 0x51d   : > { %v2816_v39 = vmul.f32 %v3334_v8, %v2787_v47  ;;  %v3515_v37 = vpop.f32.mrb[40].mxu0  ;;  %v2830_v16 = vadd.f32 %v3335_v58, %v2815_v11  ;;  %v3628_v47 = vpop.permute.xlu1 %3627 }
 0x51e   : > { %v3516_v2 = vpop.f32.mrb[41].mxu0  ;;  %v2910_v11 = vsel %vm418_vm10, %v5511_v34, %v3619_v3 }
 0x51f   : > { %v3517_v52 = vadd.f32 %v3516_v2, %v3515_v37  ;;  %v3518_v1 = vpop.f32.mrb[42].mxu0  ;;  %v2831_v29 = vadd.f32 %v3335_v58, %v2816_v39  ;;  %v2838_v50 = vmax.f32 %v2830_v16, 0.0  ;;  %v3630_v2 = vunpack.i.h.bf16 %v3628_v47 }
 0x520   : > { %v3519_v7 = vpop.f32.mrb[43].mxu0 }
 0x521   : > { %v2792_v49 = vadd.f32 %v3517_v52, %v2791_v62  ;;  %v3520_v21 = vadd.f32 %v3519_v7, %v3518_v1  ;;  %v2839_v36 = vmax.f32 %v2831_v29, 0.0  ;;  %v3629_v52 = vunpack.i.l.bf16 %v3628_v47 }
 0x523   : > { %v2817_v28 = vmul.f32 %v3334_v8, %v2792_v49  ;;  %v2795_v20 = vadd.f32 %v3520_v21, %v5191_v48  ;;  %v3621_v6 = vpack.i.bf16 %v2839_v36, %v2838_v50  ;;  %v5512_v49 = vld [vmem:[#allocation15_spill] sm:$0xff]  ;;  %v5514_v36 = vld [vmem:[#allocation14_spill] sm:$0xff] }
 0x524   : > { %v5513_v21 = vmax.f32 %v5512_v49, 0.0 }
 0x525   : > { %v2818_v26 = vmul.f32 %v3334_v8, %v2795_v20  ;;  %3622 = vrot.lane.b32.xlu0 %v3621_v6, %s3800_s15  ;;  %v3521_v15 = vpop.f32.mrb[44].mxu0  ;;  %v2832_v55 = vadd.f32 %v3335_v58, %v2817_v28  ;;  %v5515_v28 = vmax.f32 %v5514_v36, 0.0  ;;  %v3638_v6 = vpop.permute.xlu1 %3637 }
 0x526   : > { %v3522_v35 = vpop.f32.mrb[45].mxu0  ;;  %v2913_v50 = vsel %vm418_vm10, %v5513_v21, %v3630_v2 }
 0x527   : > { %v3523_v32 = vadd.f32 %v3522_v35, %v3521_v15  ;;  %v3524_v31 = vpop.f32.mrb[46].mxu0  ;;  %v2833_v12 = vadd.f32 %v3335_v58, %v2818_v26  ;;  %v2840_v14 = vmax.f32 %v2832_v55, 0.0  ;;  %v2912_v20 = vsel %vm418_vm10, %v5515_v28, %v3629_v52 }
 0x528   : > { %v3525_v5 = vpop.f32.mrb[47].mxu0  ;;  %v3640_v35 = vunpack.i.h.bf16 %v3638_v6 }
 0x529   : > { %v2800_v9 = vadd.f32 %v5187_v41, %v3523_v32  ;;  %v3526_v62 = vadd.f32 %v3525_v5, %v3524_v31  ;;  %v2841_v63 = vmax.f32 %v2833_v12, 0.0  ;;  %v3609_v41 = vunpack.i.l.bf16 %v3608_v25 }
 0x52a   : > { %v3639_v32 = vunpack.i.l.bf16 %v3638_v6 }
 0x52b   : > { %v2819_v24 = vmul.f32 %v3334_v8, %v2800_v9  ;;  %v2803_v30 = vadd.f32 %v5189_v43, %v3526_v62  ;;  %v3631_v48 = vpack.i.bf16 %v2841_v63, %v2840_v14  ;;  %v2909_v43 = vsel %vm418_vm10, %v5505_v27, %v3610_v42  ;;  %v5516_v9 = vld [vmem:[#allocation17_spill] sm:$0xff]  ;;  %v5518_v63 = vld [vmem:[#allocation16_spill] sm:$0xff] }
 0x52c   : > { %v5517_v62 = vmax.f32 %v5516_v9, 0.0 }
 0x52d   : > { %v2820_v44 = vmul.f32 %v3334_v8, %v2803_v30  ;;  %3632 = vrot.lane.b32.xlu0 %v3631_v48, %s3800_s15  ;;  %v2834_v59 = vadd.f32 %v3335_v58, %v2819_v24  ;;  %v5506_v8 = vld [vmem:[#allocation11_spill] sm:$0xff]  ;;  %v5519_v24 = vmax.f32 %v5518_v63, 0.0 }
 0x52e   : > { %v5507_v22 = vmax.f32 %v5506_v8, 0.0  ;;  %v2915_v14 = vsel %vm418_vm10, %v5517_v62, %v3640_v35  ;;  %v3099_v8 = vld [vmem:[%s3950_s17 + $0x10] sm:$0xff]  ;;  %v3106_v35 = vld [vmem:[%s3950_s17 + $0x48] sm:$0xff] }
 0x52f   : > { %v2835_v57 = vadd.f32 %v3335_v58, %v2820_v44  ;;  %v2842_v33 = vmax.f32 %v2834_v59, 0.0  ;;  %v2914_v30 = vsel %vm418_vm10, %v5519_v24, %v3639_v32 }
 0x530   : > { %v2908_v46 = vsel %vm418_vm10, %v5507_v22, %v3609_v41  ;;  %v3097_v41 = vld [vmem:[%s3950_s17] sm:$0xff] }
 0x531   : > { %v2843_v19 = vmax.f32 %v2835_v57, 0.0 }
 0x533   : > { %v3641_v18 = vpack.i.bf16 %v2843_v19, %v2842_v33  ;;  %v2940_v33 = vld [vmem:[%s5406_s11] sm:$0x3] }
 0x535   : > { %3642 = vrot.lane.b32.xlu0 %v3641_v18, %s3800_s15  ;;  %s3738_s15 = sshll.u32 %s3802_s29, 4  ;;  %s3739_s15 = int_to_ptr.vmem [resolvable:$false] %s3738_s15 }
 0x536   : > { %s3740_s18 = scalar_lea.vmem %s3739_s15, 4096  ;;  %p3741_p0 = scmp.lt.s32.totalorder %s5347_s20, %s3739_s15 }
 0x58b   : > { %v3613_v56 = vpop.permute.xlu0 %3612 }
 0x58c   : > { %v3615_v38 = vunpack.i.h.bf16 %v3613_v56  ;;  %v3614_v61 = vunpack.i.l.bf16 %v3613_v56 }
 0x58e   : > { %v2917_v58 = vsel %vm415_vm0, %v2909_v43, %v3615_v38  ;;  %v2916_v23 = vsel %vm415_vm0, %v2908_v46, %v3614_v61  ;;  %v3098_v61 = vld [vmem:[%s3950_s17 + $0x8] sm:$0xff] }
 0x58f   : > { %v2924_v17 = vpack.c.bf16 %v2917_v58, %v2916_v23  ;;  %v3100_v23 = vld [vmem:[%s3950_s17 + $0x18] sm:$0xff] }
 0x591   : > { %3348 = vmatmul.mubr.msk.bf16.vlgmr.msra.gmra.mrb[32].mxu1 %vm2344_vm12, %v2924_v17 }
 0x592   : > { %3066 = vmatprep.mubr.bf16.mxu1 %v5481_v54 }
 0x597   : > { %v3623_v10 = vpop.permute.xlu0 %3622 }
 0x598   : > { %v3625_v0 = vunpack.i.h.bf16 %v3623_v10  ;;  %v3624_v53 = vunpack.i.l.bf16 %v3623_v10 }
 0x59a   : > { %v2919_v39 = vsel %vm415_vm0, %v2911_v40, %v3625_v0  ;;  %v2918_v37 = vsel %vm415_vm0, %v2910_v11, %v3624_v53  ;;  %v3101_v40 = vld [vmem:[%s3950_s17 + $0x20] sm:$0xff]  ;;  %v3102_v11 = vld [vmem:[%s3950_s17 + $0x28] sm:$0xff] }
 0x59b   : > { %v2925_v16 = vpack.c.bf16 %v2919_v39, %v2918_v37  ;;  %v3103_v37 = vld [vmem:[%s3950_s17 + $0x30] sm:$0xff] }
 0x59d   : > { %3349 = vmatmul.mubr.msk.bf16.gmra.mrb[36].mxu1 %vm2344_vm12, %v2925_v16 }
 0x59e   : > { %3076 = vmatprep.mubr.bf16.mxu1 %v5481_v54 }
 0x59f   : > { %v3633_v1 = vpop.permute.xlu0 %3632 }
 0x5a0   : > { %v3635_v29 = vunpack.i.h.bf16 %v3633_v1  ;;  %v3634_v7 = vunpack.i.l.bf16 %v3633_v1  ;;  %v3104_v1 = vld [vmem:[%s3950_s17 + $0x38] sm:$0xff] }
 0x5a2   : > { %v2921_v26 = vsel %vm415_vm0, %v2913_v50, %v3635_v29  ;;  %v2920_v15 = vsel %vm415_vm0, %v2912_v20, %v3634_v7 }
 0x5a3   : > { %v2926_v55 = vpack.c.bf16 %v2921_v26, %v2920_v15  ;;  %v3105_v26 = vld [vmem:[%s3950_s17 + $0x40] sm:$0xff] }
 0x5a5   : > { %3350 = vmatmul.mubr.msk.bf16.gmra.mrb[40].mxu1 %vm2344_vm12, %v2926_v55 }
 0x5a6   : > { %3086 = vmatprep.mubr.bf16.mxu1 %v5481_v54  ;;  %v5520_v54 = vld [vmem:[#allocation10_spill] sm:$0xff] }
 0x5a7   : > { %v3643_v31 = vpop.permute.xlu0 %3642  ;;  %v2944_v57 = vsub.s32 0, %v5520_v54  ;;  %v2948_v19 = vsub.s32 1, %v5520_v54 }
 0x5a8   : > { %v3645_v12 = vunpack.i.h.bf16 %v3643_v31  ;;  %v3644_v5 = vunpack.i.l.bf16 %v3643_v31 }
 0x5a9   : > { %v5286_v18 = vrot.slane %v2940_v33, %v2944_v57  ;;  %v5289_v25 = vrot.slane %v2940_v33, %v2948_v19  ;;  %v3109_v19 = vld [vmem:[%s3950_s17 + $0x60] sm:$0xff] }
 0x5aa   : > { %v2923_v48 = vsel %vm415_vm0, %v2915_v14, %v3645_v12  ;;  %v2922_v44 = vsel %vm415_vm0, %v2914_v30, %v3644_v5  ;;  %v3107_v12 = vld [vmem:[%s3950_s17 + $0x50] sm:$0xff]  ;;  %v3108_v14 = vld [vmem:[%s3950_s17 + $0x58] sm:$0xff] }
 0x5ab   : > { %v2927_v59 = vpack.c.bf16 %v2923_v48, %v2922_v44 }
 0x5ad   : > { %3351 = vmatmul.mubr.msk.bf16.gmra.mrb[44].mxu1 %vm2344_vm12, %v2927_v59 }
 0x664   : > { %v3058_v42 = vpop.f32.mrb[32].mxu1 }
 0x665   : > { %v3059_v56 = vadd.f32 %v3058_v42, %v5286_v18  ;;  %v3060_v38 = vpop.f32.mrb[33].mxu1 }
 0x666   : > { %v3061_v27 = vadd.f32 %v3060_v38, %v5289_v25  ;;  %v3062_v43 = vpop.f32.mrb[34].mxu1 }
 0x667   : > { %v3113_v22 = vadd.f32 %v3097_v41, %v3059_v56  ;;  %v3063_v46 = vadd.f32 %v3062_v43, %v5286_v18  ;;  %v3064_v58 = vpop.f32.mrb[35].mxu1  ;;  %v3110_v56 = vld [vmem:[%s3950_s17 + $0x68] sm:$0xff] }
 0x668   : > { %v3114_v17 = vadd.f32 %v3098_v61, %v3061_v27  ;;  %v3065_v13 = vadd.f32 %v3064_v58, %v5289_v25  ;;  %v3111_v27 = vld [vmem:[%s3950_s17 + $0x70] sm:$0xff] }
 0x669   : > { %v3129_v4 = vmax.f32 %v3113_v22, 0.0  ;;  %v3115_v3 = vadd.f32 %v3099_v8, %v3063_v46  ;;  %v3112_v46 = vld [vmem:[%s3950_s17 + $0x78] sm:$0xff]  ;;  %s3734_s17 = scalar_lea.vmem %s5347_s20, 2048 }
 0x66a   : > { %v3130_v10 = vmax.f32 %v3114_v17, 0.0  ;;  %v3116_v0 = vadd.f32 %v3100_v23, %v3065_v13  ;;  %p3735_p11 = scmp.ne.s32.totalorder %s5347_s20, %s3734_s17  ;;  %p3742_p1 = scmp.lt.s32.totalorder %s3740_s18, %s3734_s17 }
 0x66b   : > { %3145 = vst [vmem:[%s5301_s30] sm:$0xff] %v3129_v4  ;;  %v3131_v53 = vmax.f32 %v3115_v3, 0.0 }
 0x66c   : > { %3146 = vst [vmem:[%s5301_s30 + $0x8] sm:$0xff] %v3130_v10  ;;  %v3132_v60 = vmax.f32 %v3116_v0, 0.0  ;;  %p3736_p12 = pnand %p3735_p11, %p3908_p5  ;;  %p3743_p2 = por %p3742_p1, %p3741_p0 }
 0x66d   : > { %3147 = vst [vmem:[%s5301_s30 + $0x10] sm:$0xff] %v3131_v53 }
 0x66e   : > { %3148 = vst [vmem:[%s5301_s30 + $0x18] sm:$0xff] %v3132_v60  ;;  %p3737_p13 = pneg %p3736_p12 }
 0x670   : > { %v3068_v45 = vpop.f32.mrb[36].mxu1  ;;  %p3744_p3 = pnand %p3743_p2, %p3737_p13 }
 0x671   : > { %v3069_v51 = vadd.f32 %v3068_v45, %v5286_v18  ;;  %v3070_v34 = vpop.f32.mrb[37].mxu1 }
 0x672   : > { %v3071_v47 = vadd.f32 %v3070_v34, %v5289_v25  ;;  %v3072_v39 = vpop.f32.mrb[38].mxu1 }
 0x673   : > { %v3117_v16 = vadd.f32 %v3101_v40, %v3069_v51  ;;  %v3073_v2 = vadd.f32 %v3072_v39, %v5286_v18  ;;  %v3074_v52 = vpop.f32.mrb[39].mxu1 }
 0x674   : > { %v3118_v29 = vadd.f32 %v3102_v11, %v3071_v47  ;;  %v3075_v7 = vadd.f32 %v3074_v52, %v5289_v25 }
 0x675   : > { %v3133_v49 = vmax.f32 %v3117_v16, 0.0  ;;  %v3119_v21 = vadd.f32 %v3103_v37, %v3073_v2 }
 0x676   : > { %v3134_v50 = vmax.f32 %v3118_v29, 0.0  ;;  %v3120_v36 = vadd.f32 %v3104_v1, %v3075_v7 }
 0x677   : > { %3149 = vst [vmem:[%s5301_s30 + $0x20] sm:$0xff] %v3133_v49  ;;  %v3135_v28 = vmax.f32 %v3119_v21, 0.0 }
 0x678   : > { %3150 = vst [vmem:[%s5301_s30 + $0x28] sm:$0xff] %v3134_v50  ;;  %v3136_v20 = vmax.f32 %v3120_v36, 0.0  ;;  %v3078_v6 = vpop.f32.mrb[40].mxu1 }
 0x679   : > { %3151 = vst [vmem:[%s5301_s30 + $0x30] sm:$0xff] %v3135_v28  ;;  %v3079_v15 = vadd.f32 %v3078_v6, %v5286_v18  ;;  %v3080_v55 = vpop.f32.mrb[41].mxu1 }
 0x67a   : > { %3152 = vst [vmem:[%s5301_s30 + $0x38] sm:$0xff] %v3136_v20  ;;  %v3081_v32 = vadd.f32 %v3080_v55, %v5289_v25  ;;  %v3082_v31 = vpop.f32.mrb[42].mxu1 }
 0x67b   : > { %v3121_v5 = vadd.f32 %v3105_v26, %v3079_v15  ;;  %v3083_v9 = vadd.f32 %v3082_v31, %v5286_v18  ;;  %v3084_v62 = vpop.f32.mrb[43].mxu1 }
 0x67c   : > { %v3122_v63 = vadd.f32 %v3106_v35, %v3081_v32  ;;  %v3085_v24 = vadd.f32 %v3084_v62, %v5289_v25 }
 0x67d   : > { %v3137_v30 = vmax.f32 %v3121_v5, 0.0  ;;  %v3123_v48 = vadd.f32 %v3107_v12, %v3083_v9 }
 0x67e   : > { %v3138_v44 = vmax.f32 %v3122_v63, 0.0  ;;  %v3124_v59 = vadd.f32 %v3108_v14, %v3085_v24 }
 0x67f   : > { %3153 = vst [vmem:[%s5301_s30 + $0x40] sm:$0xff] %v3137_v30  ;;  %v3139_v54 = vmax.f32 %v3123_v48, 0.0 }
 0x680   : > { %3154 = vst [vmem:[%s5301_s30 + $0x48] sm:$0xff] %v3138_v44  ;;  %v3140_v57 = vmax.f32 %v3124_v59, 0.0  ;;  %v3088_v33 = vpop.f32.mrb[44].mxu1 }
 0x681   : > { %3155 = vst [vmem:[%s5301_s30 + $0x50] sm:$0xff] %v3139_v54  ;;  %v3089_v42 = vadd.f32 %v3088_v33, %v5286_v18  ;;  %v3090_v41 = vpop.f32.mrb[45].mxu1 }
 0x682   : > { %3156 = vst [vmem:[%s5301_s30 + $0x58] sm:$0xff] %v3140_v57  ;;  %v3091_v38 = vadd.f32 %v3090_v41, %v5289_v25  ;;  %v3092_v61 = vpop.f32.mrb[46].mxu1 }
 0x683   : > { %v3125_v43 = vadd.f32 %v3109_v19, %v3089_v42  ;;  %v3093_v8 = vadd.f32 %v3092_v61, %v5286_v18  ;;  %v3094_v22 = vpop.f32.mrb[47].mxu1 }
 0x684   : > { %v3126_v58 = vadd.f32 %v3110_v56, %v3091_v38  ;;  %v3095_v23 = vadd.f32 %v3094_v22, %v5289_v25 }
 0x685   : > { %v3141_v17 = vmax.f32 %v3125_v43, 0.0  ;;  %v3127_v13 = vadd.f32 %v3111_v27, %v3093_v8 }
 0x686   : > { %v3142_v4 = vmax.f32 %v3126_v58, 0.0  ;;  %v3128_v3 = vadd.f32 %v3112_v46, %v3095_v23 }
 0x687   : > { %3157 = vst [vmem:[%s5301_s30 + $0x60] sm:$0xff] %v3141_v17  ;;  %v3143_v10 = vmax.f32 %v3127_v13, 0.0 }
 0x688   : > { %3158 = vst [vmem:[%s5301_s30 + $0x68] sm:$0xff] %v3142_v4  ;;  %v3144_v18 = vmax.f32 %v3128_v3, 0.0 }
 0x689   : > { %3159 = vst [vmem:[%s5301_s30 + $0x70] sm:$0xff] %v3143_v10 }
 0x68a   : > { %3160 = vst [vmem:[%s5301_s30 + $0x78] sm:$0xff] %v3144_v18 }
 0x68b   : > { %3747 = shalt.err (!%p3744_p3)
}
 0x68c   : > { %s3748_s16 = scalar_lea.hbm %s5345_s28, 2048  ;;  %s3752_s19 = scalar_lea.hbm %s5407_s12, 4096 }
 0x68d   : > { %p3749_p4 = scmp.ne.s32.totalorder %s5345_s28, %s3748_s16  ;;  %p3753_p9 = scmp.lt.u32.totalorder %s5345_s28, %s5407_s12 }
 0x68e   : > { %p3754_p10 = scmp.lt.u32.totalorder %s3752_s19, %s3748_s16  ;;  %p3756_p12 = scmp.lt.u32.totalorder %s3748_s16, %s5345_s28 }
 0x68f   : > { %p3750_p7 = pnand %p3749_p4, %p3908_p5 }
 0x690   : > { %p3755_p11 = por %p3754_p10, %p3753_p9 }
 0x691   : > { %p3751_p8 = pneg %p3750_p7 }
 0x692   : > { %p3757_p13 = por %p3756_p12, %p3755_p11 }
 0x694   : > { %p3758_p0 = pnand %p3757_p13, %p3751_p8 }
 0x696   : > { %3761 = shalt.err (!%p3758_p0)
}
 0x697   : > { %s3803_s17 = smov 256   ;;  %s3804_s29 = smov 16  }
 0x698   : > { %3561 = dma.vmem_to_hbm [thread:$0]  (%p3908_p5), %s5347_s20, 2048, %s5345_s28, %s5354_s25, %s3803_s17, %s3803_s17, %s3804_s29  }
 0x699 PF: > { %p3567_p1 = scmp.ge.s32.totalorder %s3796_s24, 2  ;;  %s3190_s15 = sand.u32 1, %s3784_s21  }
 0x69a   : > { %s3191_s18 = scalar_lea.sflag [#allocation5], %s3190_s15 }
 0x69b   : > { %p3564_p2 = pnand %p3567_p1, %p3912_p6 }
 0x69d   : > { %3779 = dma.done.wait (!%p3564_p2), %s3191_s18, 2048  }
 0x69e   : > { %3781 = vsyncadd (!%p3564_p2), %s3191_s18, 4294965248  ;;  %s5521_s24 = sld [smem:[#allocation8_spill]]  ;;  %s5522_s16 = sld [smem:[#allocation7_spill]] }
 0x69f   : > { %s5523_s23 = sld [smem:[#allocation9_spill]]  ;;  %s5524_s21 = smov %s3788_s22 }
 0x6a4   : > { %p22_p3 = scmp.ge.s32.totalorder %s5521_s24, 4   ;;  %s5525_s22 = smov %s5522_s16 }
 0x6a6   :  { %24 = sbr.rel (!%p22_p3) target bundleno = 3 (0x3), region = 103 }
 0x6ad   :  { %3196 = vsyncpa [#allocation5], 1 }
 0x6ae   :  { %3198 = vsyncpa [#allocation5 + $0x1], 1 }

</bundles_post_ra>
